<compile_context>
chip_gen: v7x
topology: tpu7x:2x2x1
jax: 0.10.0
libtpu: 0.0.40
codegen_flags: <defaults>
</compile_context>

<pallas_src>
import functools

import jax
import jax.numpy as jnp
from jax.experimental import pallas as pl
from jax.experimental.pallas import tpu as pltpu

_HALO_BLOCK = 128   # lane-dim halo block width (minimum lane tile)


# --------------------------------- kernel ------------------------------------
def _leaky(h):
    return jnp.where(h >= 0, h, 0.2 * h)


def _conv3(h, w, b, d, n_out, cin):
    """Dilated 3-tap conv as MXU matmul(s).

    h: (cin, n_out + 2*d) f32, already zeroed outside the sequence.
    w: (cout, 3*cin) packed so w[:, k*cin + ci] is tap k, input channel ci
       (stream dtype: bf16 when streaming bf16, else f32).
    b: (cout, 1) f32.
    Returns (cout, n_out) f32.
    """
    if cin % 8 == 0 and cin >= 128:
        # Wide channels: single im2col matmul (K = 3*cin) keeps the MXU busy.
        taps = jnp.concatenate([h[:, k * d:k * d + n_out] for k in range(3)],
                               axis=0).astype(w.dtype)
        acc = jnp.dot(w, taps, preferred_element_type=jnp.float32)
    else:
        # Small / unaligned channels: 3 accumulated matmuls, no im2col concat
        # (avoids the sublane-concat copies that pressure v5e's single vst slot).
        acc = None
        for k in range(3):
            tap = h[:, k * d:k * d + n_out].astype(w.dtype)
            part = jnp.dot(w[:, k * cin:(k + 1) * cin], tap,
                           preferred_element_type=jnp.float32)
            acc = part if acc is None else acc + part
    return acc + b


def _residual_kernel(xl, xm, xr, s1l, s1m, s1r, h1l, h1m, h1r,
                     s2l, s2m, s2r, h2l, h2m, h2r,
                     u_ref, w1_ref, b1_ref, w2_ref, b2_ref, out_ref,
                     *, dilation, lup, tl, hb, cin, cout):
    d = dilation
    i = pl.program_id(1)
    s = i * tl                       # global start column (upsampled coords)
    f32 = jnp.float32

    def film_window(l_ref, m_ref, r_ref, w):
        """FiLM tensor over upsampled columns [s - w, s + tl + w), with the
        halo-derived edge pieces zeroed outside [0, lup) so the dilated convs
        see Conv1d's zero padding.  Only the 2*w edge columns pay mask work."""
        lp = l_ref[:, hb - w:].astype(f32)
        rp = r_ref[:, :w].astype(f32)
        lcols = jax.lax.broadcasted_iota(jnp.int32, (cin, w), 1) + (s - w)
        rcols = jax.lax.broadcasted_iota(jnp.int32, (cin, w), 1) + (s + tl)
        lp = jnp.where(lcols >= 0, lp, 0.0)
        rp = jnp.where(rcols < lup, rp, 0.0)
        return jnp.concatenate([lp, m_ref[...].astype(f32), rp], axis=-1)

    # ---- x window at input resolution + in-kernel x2 nearest upsample --------
    # Original-resolution columns [s//2 - d, s//2 + tl//2 + d).
    x_win = jnp.concatenate([xl[:, hb - d:], xm[...], xr[:, :d]], axis=-1)
    # Nearest x2 along the lane axis as a one-hot expansion matmul
    # (u[j, c] == 1 iff c // 2 == j).  Garbage in out-of-sequence halo columns
    # is harmless: the corresponding FiLM columns below are masked to zero.
    x_up = jnp.dot(x_win, u_ref[...],
                   preferred_element_type=f32)          # (cin, tl + 4d)

    # ---- FiLM #1 + LeakyReLU on [s - 2d, s + tl + 2d) -------------------------
    a1 = _leaky(film_window(s1l, s1m, s1r, 2 * d) * x_up
                + film_window(h1l, h1m, h1r, 2 * d))

    # ---- conv1 (Cin -> Cin): output columns [s - d, s + tl + d) ---------------
    c1 = _conv3(a1, w1_ref[...], b1_ref[...].astype(f32), d, tl + 2 * d, cin)

    # ---- FiLM #2 + LeakyReLU on [s - d, s + tl + d) ---------------------------
    a2 = _leaky(film_window(s2l, s2m, s2r, d) * c1
                + film_window(h2l, h2m, h2r, d))

    # ---- conv2 (Cin -> Cout): output columns [s, s + tl) ----------------------
    out = _conv3(a2, w2_ref[...], b2_ref[...].astype(f32), d, tl, cin)
    out_ref[...] = out.astype(out_ref.dtype)


# ------------------------- VMEM / tile sizing helpers -------------------------
def _physical_vmem_bytes():
    try:
        info = pltpu.get_tpu_info()
        v = int(getattr(info, "vmem_capacity_bytes", 0))
        if v > 0:
            return v
    except Exception:
        pass
    return 64 * 2**20   # conservative fallback: v7x per-TensorCore VMEM


def _vmem_budget_and_physical():
    phys = _physical_vmem_bytes()
    # ~40-44 MiB on 128 MiB chips (v5e/v6e), ~21 MiB on v7x's 64 MiB.
    budget = int(min(max(phys // 3, 16 * 2**20), 44 * 2**20))
    return budget, phys


def _vmem_bytes_estimate(t, cin, cout, d, stream_bytes, param_bytes):
    """Honest per-grid-step VMEM footprint for tile width t (upsampled cols)."""
    hb = _HALO_BLOCK
    th = t // 2
    film = 4 * 2 * cin * (t + 2 * hb) * stream_bytes        # 4 FiLM streams, 2 bufs
    xs = 2 * cin * (th + 2 * hb) * stream_bytes             # x at input resolution
    out = 2 * cout * t * stream_bytes                       # output tile, 2 bufs
    ups = 2 * (th + 2 * d) * (t + 4 * d) * stream_bytes     # upsample matrix
    wgt = 2 * (3 * cin * (cin + cout) * param_bytes + 4 * (cin + cout))
    tmp = 4 * (10 * cin + 2 * cout) * (t + 4 * d)           # f32 in-kernel temps
    return film + xs + out + ups + wgt + tmp


def _pick_tile_cols(lup, cin, cout, d, stream_bytes, param_bytes, batch,
                    budget_bytes, cap=2048):
    """Largest L_up tile (multiple of 256 dividing L_up) inside the VMEM budget
    that still leaves >= 8 grid steps for the software pipeline / megacore."""
    cands = [t for t in range(256, min(lup, cap) + 1, 256) if lup % t == 0]
    fitting = [t for t in cands
               if _vmem_bytes_estimate(t, cin, cout, d, stream_bytes,
                                       param_bytes) <= budget_bytes]
    if not fitting:
        fitting = cands[:1]           # huge channel counts: smallest legal tile
    deep = [t for t in fitting if batch * (lup // t) >= 8]
    return max(deep) if deep else min(fitting)


# -------------------------------- wrapper ------------------------------------
def residual_forward(x, film_out_pitch, film_out_noisy, params, dilation, *,
                     tile_cols=None):
    """x: (B, Cin, L) NCL.  film_out_*: (scale, shift), each (B, Cin, 2L).
    params: (w1 (Cin,Cin,3), b1 (Cin,), w2 (Cout,Cin,3), b2 (Cout,)), PyTorch layout.
    Returns (B, Cout, 2L) in x.dtype (bf16 in -> bf16 streaming + bf16 MXU)."""
    scale1, shift1 = film_out_pitch
    scale2, shift2 = film_out_noisy
    w1, b1, w2, b2 = params

    B, Cin, L = x.shape
    Lup = 2 * L
    Cout = w2.shape[0]
    hb = _HALO_BLOCK
    d = int(dilation)

    assert L % hb == 0, f"L must be a multiple of {hb} (got {L})"
    assert 1 <= d and 2 * d <= hb, d
    for arr in (scale1, shift1, scale2, shift2):
        assert arr.shape == (B, Cin, Lup), arr.shape

    stream_dtype = jnp.dtype(x.dtype)
    param_dtype = (jnp.bfloat16 if stream_dtype == jnp.dtype(jnp.bfloat16)
                   else jnp.float32)
    sbytes = stream_dtype.itemsize
    pbytes = jnp.dtype(param_dtype).itemsize

    budget, phys = _vmem_budget_and_physical()
    if tile_cols is None:
        tl = _pick_tile_cols(Lup, Cin, Cout, d, sbytes, pbytes, B, budget)
    else:
        tl = int(tile_cols)
    assert tl % 256 == 0 and Lup % tl == 0, (tl, Lup)

    tl_h = tl // 2
    n_tiles = Lup // tl
    r = tl // hb
    r_h = tl_h // hb
    n_hb = Lup // hb
    n_hb_h = L // hb

    # Pack conv weights (Cout, Cin, 3) -> (Cout, 3*Cin), tap-major columns,
    # in the stream-matched MXU dtype.  Biases stay f32 (tiny).
    w1p = jnp.transpose(w1, (0, 2, 1)).reshape(Cin, 3 * Cin).astype(param_dtype)
    w2p = jnp.transpose(w2, (0, 2, 1)).reshape(Cout, 3 * Cin).astype(param_dtype)
    b1c = b1.reshape(Cin, 1).astype(jnp.float32)
    b2c = b2.reshape(Cout, 1).astype(jnp.float32)

    # One-hot x2 lane-expansion matrix (tile-index independent): u[j, c] = (c//2 == j).
    n_x = tl_h + 2 * d
    w1w = tl + 4 * d
    up_mat = (jnp.arange(w1w)[None, :] // 2
              == jnp.arange(n_x)[:, None]).astype(stream_dtype)

    # BlockSpecs: (left-halo | main | right-halo) per stream, with clamped block
    # indices at the sequence edges (out-of-sequence columns masked in-kernel).
    film_left = pl.BlockSpec((None, Cin, hb),
                             lambda b, i: (b, 0, jnp.maximum(i * r - 1, 0)))
    film_main = pl.BlockSpec((None, Cin, tl), lambda b, i: (b, 0, i))
    film_right = pl.BlockSpec((None, Cin, hb),
                              lambda b, i: (b, 0, jnp.minimum(i * r + r, n_hb - 1)))
    x_left = pl.BlockSpec((None, Cin, hb),
                          lambda b, i: (b, 0, jnp.maximum(i * r_h - 1, 0)))
    x_main = pl.BlockSpec((None, Cin, tl_h), lambda b, i: (b, 0, i))
    x_right = pl.BlockSpec((None, Cin, hb),
                           lambda b, i: (b, 0, jnp.minimum(i * r_h + r_h, n_hb_h - 1)))

    args = [x, x, x,
            scale1, scale1, scale1, shift1, shift1, shift1,
            scale2, scale2, scale2, shift2, shift2, shift2,
            up_mat, w1p, b1c, w2p, b2c]
    in_specs = ([x_left, x_main, x_right]
                + [film_left, film_main, film_right] * 4
                + [pl.BlockSpec((n_x, w1w), lambda b, i: (0, 0)),
                   pl.BlockSpec((Cin, 3 * Cin), lambda b, i: (0, 0)),
                   pl.BlockSpec((Cin, 1), lambda b, i: (0, 0)),
                   pl.BlockSpec((Cout, 3 * Cin), lambda b, i: (0, 0)),
                   pl.BlockSpec((Cout, 1), lambda b, i: (0, 0))])

    # Explicit VMEM limit: headroom over the honest estimate, clamped to the
    # generation's physical VMEM (never exceeds v7x's 64 MiB per-core VMEM).
    est = _vmem_bytes_estimate(tl, Cin, Cout, d, sbytes, pbytes)
    vmem_limit = max(32 * 2**20, 2 * est)
    vmem_limit = int(min(vmem_limit, 0.78 * phys))
    vmem_limit = int(max(vmem_limit, min(est + (4 << 20), 0.9 * phys)))

    kernel = functools.partial(
        _residual_kernel, dilation=d, lup=Lup, tl=tl, hb=hb, cin=Cin, cout=Cout)

    return pl.pallas_call(
        kernel,
        out_shape=jax.ShapeDtypeStruct((B, Cout, Lup), x.dtype),
        grid_spec=pltpu.PrefetchScalarGridSpec(
            num_scalar_prefetch=0,
            grid=(B, n_tiles),
            in_specs=in_specs,
            out_specs=pl.BlockSpec((None, Cout, tl), lambda b, i: (b, 0, i)),
        ),
        compiler_params=pltpu.CompilerParams(
            dimension_semantics=("parallel", "parallel"),
            vmem_limit_bytes=vmem_limit),
    )(*args)


# --------------------- pure-JAX reference (for checking) ---------------------
def _conv1d_ref(x_ncl, w_oik, bias, dilation):
    out = jax.lax.conv_general_dilated(
        x_ncl, w_oik, window_strides=(1,),
        padding=[(dilation, dilation)], rhs_dilation=(dilation,),
        dimension_numbers=("NCH", "OIH", "NCH"),
        precision=jax.lax.Precision.HIGHEST)
    return out + bias[None, :, None]


def residual_ref(x, film_pitch, film_noisy, params, dilation):
    (s1, sh1), (s2, sh2) = film_pitch, film_noisy
    w1, b1, w2, b2 = params
    h = jnp.repeat(x, 2, axis=-1)
    h = s1 * h + sh1
    h = _conv1d_ref(jnp.where(h >= 0, h, 0.2 * h), w1, b1, dilation)
    h = s2 * h + sh2
    return _conv1d_ref(jnp.where(h >= 0, h, 0.2 * h), w2, b2, dilation)


# ----------------------------------- demo ------------------------------------
def _run_case(case_id, key, *, B, Cin, Cout, L, dilation, dtype, tile_cols, tol):
    Lup = 2 * L
    ks = jax.random.split(key, 9)
    f32 = jnp.float32
    x = jax.random.normal(ks[0], (B, Cin, L), dtype=f32)
    s1 = jax.random.normal(ks[1], (B, Cin, Lup), dtype=f32)
    sh1 = jax.random.normal(ks[2], (B, Cin, Lup), dtype=f32)
    s2 = jax.random.normal(ks[3], (B, Cin, Lup), dtype=f32)
    sh2 = jax.random.normal(ks[4], (B, Cin, Lup), dtype=f32)
    w1 = jax.random.normal(ks[5], (Cin, Cin, 3), dtype=f32) * 0.2
    b1 = jax.random.normal(ks[6], (Cin,), dtype=f32) * 0.1
    w2 = jax.random.normal(ks[7], (Cout, Cin, 3), dtype=f32) * 0.2
    b2 = jax.random.normal(ks[8], (Cout,), dtype=f32) * 0.1
    params = (w1, b1, w2, b2)

    cast = lambda a: a.astype(dtype)
    out = residual_forward(cast(x), (cast(s1), cast(sh1)),
                           (cast(s2), cast(sh2)), params, dilation,
                           tile_cols=tile_cols)
    out = jax.block_until_ready(out)
    assert out.shape == (B, Cout, Lup), out.shape
    assert out.dtype == jnp.dtype(dtype), out.dtype

    # Reference sees the same rounded activations and the same (possibly bf16)
    # weights the kernel's MXU path uses.
    pdt = jnp.bfloat16 if jnp.dtype(dtype) == jnp.dtype(jnp.bfloat16) else f32
    up = lambda a: cast(a).astype(f32)
    upp = lambda a: a.astype(pdt).astype(f32)
    ref = residual_ref(up(x), (up(s1), up(sh1)), (up(s2), up(sh2)),
                       (upp(w1), b1, upp(w2), b2), dilation)
    err = float(jnp.max(jnp.abs(out.astype(f32) - ref)))
    assert err <= tol, f"case {case_id}: max abs err {err} > {tol}"


if __name__ == "__main__":
    key = jax.random.PRNGKey(0)
    k1, k2, k3, k4 = jax.random.split(key, 4)
    # 1) multi-tile along L_up, sublane-unaligned channels -> 3-matmul conv path
    _run_case(1, k1, B=2, Cin=4, Cout=8, L=256, dilation=2,
              dtype=jnp.float32, tile_cols=256, tol=1e-4)
    # 2) single tile: both sequence edges (clamped halos + masks) in one tile
    _run_case(2, k2, B=1, Cin=8, Cout=16, L=128, dilation=4,
              dtype=jnp.float32, tile_cols=None, tol=1e-4)
    # 3) bf16 streaming of x/FiLM + bf16 weights and upsample matrix on the MXU
    _run_case(3, k3, B=2, Cin=8, Cout=8, L=256, dilation=1,
              dtype=jnp.bfloat16, tile_cols=256, tol=1e-1)
    # 4) wide channels -> im2col single-matmul conv path (wider f32 accumulation)
    _run_case(4, k4, B=1, Cin=128, Cout=64, L=128, dilation=8,
              dtype=jnp.float32, tile_cols=None, tol=5e-3)
    print("KERNEL_OK")
</pallas_src>

<mosaic_0001>
module attributes {stable_mosaic.version = 11 : i64} {
  func.func @_residual_kernel(%arg0: i32, %arg1: i32, %arg2: memref<1x4x128xf32, #tpu.memory_space<vmem>>, %arg3: memref<1x4x128xf32, #tpu.memory_space<vmem>>, %arg4: memref<1x4x128xf32, #tpu.memory_space<vmem>>, %arg5: memref<1x4x128xf32, #tpu.memory_space<vmem>>, %arg6: memref<1x4x256xf32, #tpu.memory_space<vmem>>, %arg7: memref<1x4x128xf32, #tpu.memory_space<vmem>>, %arg8: memref<1x4x128xf32, #tpu.memory_space<vmem>>, %arg9: memref<1x4x256xf32, #tpu.memory_space<vmem>>, %arg10: memref<1x4x128xf32, #tpu.memory_space<vmem>>, %arg11: memref<1x4x128xf32, #tpu.memory_space<vmem>>, %arg12: memref<1x4x256xf32, #tpu.memory_space<vmem>>, %arg13: memref<1x4x128xf32, #tpu.memory_space<vmem>>, %arg14: memref<1x4x128xf32, #tpu.memory_space<vmem>>, %arg15: memref<1x4x256xf32, #tpu.memory_space<vmem>>, %arg16: memref<1x4x128xf32, #tpu.memory_space<vmem>>, %arg17: memref<132x264xf32, #tpu.memory_space<vmem>>, %arg18: memref<4x12xf32, #tpu.memory_space<vmem>>, %arg19: memref<4x1xf32, #tpu.memory_space<vmem>>, %arg20: memref<8x12xf32, #tpu.memory_space<vmem>>, %arg21: memref<8x1xf32, #tpu.memory_space<vmem>>, %arg22: memref<1x8x256xf32, #tpu.memory_space<vmem>>) attributes {dimension_semantics = [#tpu.dimension_semantics<parallel>, #tpu.dimension_semantics<parallel>], iteration_bounds = array<i64: 2, 2>, scalar_prefetch = 0 : i64, scratch_operands = 0 : i64, tpu.core_type = #tpu.core_type<tc>, window_params = [{transform_indices = @transform_0, window_bounds = array<i64: 1, 4, 128>}, {transform_indices = @transform_1, window_bounds = array<i64: 1, 4, 128>}, {transform_indices = @transform_2, window_bounds = array<i64: 1, 4, 128>}, {transform_indices = @transform_3, window_bounds = array<i64: 1, 4, 128>}, {transform_indices = @transform_4, window_bounds = array<i64: 1, 4, 256>}, {transform_indices = @transform_5, window_bounds = array<i64: 1, 4, 128>}, {transform_indices = @transform_6, window_bounds = array<i64: 1, 4, 128>}, {transform_indices = @transform_7, window_bounds = array<i64: 1, 4, 256>}, {transform_indices = @transform_8, window_bounds = array<i64: 1, 4, 128>}, {transform_indices = @transform_9, window_bounds = array<i64: 1, 4, 128>}, {transform_indices = @transform_10, window_bounds = array<i64: 1, 4, 256>}, {transform_indices = @transform_11, window_bounds = array<i64: 1, 4, 128>}, {transform_indices = @transform_12, window_bounds = array<i64: 1, 4, 128>}, {transform_indices = @transform_13, window_bounds = array<i64: 1, 4, 256>}, {transform_indices = @transform_14, window_bounds = array<i64: 1, 4, 128>}, {pipeline_mode = #tpu.pipeline_mode<synchronous>, transform_indices = @transform_15, window_bounds = array<i64: 132, 264>}, {pipeline_mode = #tpu.pipeline_mode<synchronous>, transform_indices = @transform_16, window_bounds = array<i64: 4, 12>}, {pipeline_mode = #tpu.pipeline_mode<synchronous>, transform_indices = @transform_17, window_bounds = array<i64: 4, 1>}, {pipeline_mode = #tpu.pipeline_mode<synchronous>, transform_indices = @transform_18, window_bounds = array<i64: 8, 12>}, {pipeline_mode = #tpu.pipeline_mode<synchronous>, transform_indices = @transform_19, window_bounds = array<i64: 8, 1>}, {transform_indices = @transform_20, window_bounds = array<i64: 1, 8, 256>}]} {
    %c256_i32 = arith.constant 256 : i32
    %0 = arith.muli %arg1, %c256_i32 : i32
    %c0 = arith.constant 0 : index
    %c0_0 = arith.constant 0 : index
    %c126 = arith.constant 126 : index
    %1 = vector.load %arg2[%c0, %c0_0, %c126] : memref<1x4x128xf32, #tpu.memory_space<vmem>>, vector<1x4x2xf32>
    %2 = vector.shape_cast %1 : vector<1x4x2xf32> to vector<4x2xf32>
    %c0_1 = arith.constant 0 : index
    %c0_2 = arith.constant 0 : index
    %c0_3 = arith.constant 0 : index
    %3 = vector.load %arg3[%c0_1, %c0_2, %c0_3] : memref<1x4x128xf32, #tpu.memory_space<vmem>>, vector<1x4x128xf32>
    %4 = vector.shape_cast %3 : vector<1x4x128xf32> to vector<4x128xf32>
    %c0_4 = arith.constant 0 : index
    %c0_5 = arith.constant 0 : index
    %c0_6 = arith.constant 0 : index
    %5 = vector.load %arg4[%c0_4, %c0_5, %c0_6] : memref<1x4x128xf32, #tpu.memory_space<vmem>>, vector<1x4x2xf32>
    %6 = vector.shape_cast %5 : vector<1x4x2xf32> to vector<4x2xf32>
    %7 = tpu.concatenate %2, %4, %6 in 1 : vector<4x2xf32>, vector<4x128xf32>, vector<4x2xf32> -> vector<4x132xf32>
    %c0_7 = arith.constant 0 : index
    %c0_8 = arith.constant 0 : index
    %8 = vector.load %arg17[%c0_7, %c0_8] : memref<132x264xf32, #tpu.memory_space<vmem>>, vector<132x264xf32>
    %cst = arith.constant dense<0.000000e+00> : vector<4x264xf32>
    %9 = tpu.matmul %7, %8, %cst {dimension_numbers = #tpu.dot_dimension_numbers<[1], [0], [0], [1], [0, 0, 1, 1], [], []>} : vector<4x132xf32>, vector<132x264xf32>, vector<4x264xf32> -> vector<4x264xf32>
    %c0_9 = arith.constant 0 : index
    %c0_10 = arith.constant 0 : index
    %c124 = arith.constant 124 : index
    %10 = vector.load %arg5[%c0_9, %c0_10, %c124] : memref<1x4x128xf32, #tpu.memory_space<vmem>>, vector<1x4x4xf32>
    %11 = vector.shape_cast %10 : vector<1x4x4xf32> to vector<4x4xf32>
    %c0_11 = arith.constant 0 : index
    %c0_12 = arith.constant 0 : index
    %c0_13 = arith.constant 0 : index
    %12 = vector.load %arg7[%c0_11, %c0_12, %c0_13] : memref<1x4x128xf32, #tpu.memory_space<vmem>>, vector<1x4x4xf32>
    %13 = vector.shape_cast %12 : vector<1x4x4xf32> to vector<4x4xf32>
    %14 = tpu.iota {dimensions = array<i32: 1>} : vector<4x4xi32>
    %c4_i32 = arith.constant 4 : i32
    %15 = arith.subi %0, %c4_i32 : i32
    %16 = vector.broadcast %15 : i32 to vector<4x4xi32>
    %17 = arith.addi %14, %16 : vector<4x4xi32>
    %18 = tpu.iota {dimensions = array<i32: 1>} : vector<4x4xi32>
    %c256_i32_14 = arith.constant 256 : i32
    %19 = arith.addi %0, %c256_i32_14 : i32
    %20 = vector.broadcast %19 : i32 to vector<4x4xi32>
    %21 = arith.addi %18, %20 : vector<4x4xi32>
    %c0_i32 = arith.constant 0 : i32
    %22 = vector.broadcast %c0_i32 : i32 to vector<4x4xi32>
    %23 = arith.cmpi sge, %17, %22 : vector<4x4xi32>
    %cst_15 = arith.constant 0.000000e+00 : f32
    %24 = vector.broadcast %cst_15 : f32 to vector<4x4xf32>
    %25 = arith.select %23, %11, %24 : vector<4x4xi1>, vector<4x4xf32>
    %c512_i32 = arith.constant 512 : i32
    %26 = vector.broadcast %c512_i32 : i32 to vector<4x4xi32>
    %27 = arith.cmpi slt, %21, %26 : vector<4x4xi32>
    %cst_16 = arith.constant 0.000000e+00 : f32
    %28 = vector.broadcast %cst_16 : f32 to vector<4x4xf32>
    %29 = arith.select %27, %13, %28 : vector<4x4xi1>, vector<4x4xf32>
    %c0_17 = arith.constant 0 : index
    %c0_18 = arith.constant 0 : index
    %c0_19 = arith.constant 0 : index
    %30 = vector.load %arg6[%c0_17, %c0_18, %c0_19] : memref<1x4x256xf32, #tpu.memory_space<vmem>>, vector<1x4x256xf32>
    %31 = vector.shape_cast %30 : vector<1x4x256xf32> to vector<4x256xf32>
    %32 = tpu.concatenate %25, %31, %29 in 1 : vector<4x4xf32>, vector<4x256xf32>, vector<4x4xf32> -> vector<4x264xf32>
    %33 = arith.mulf %32, %9 : vector<4x264xf32>
    %c0_20 = arith.constant 0 : index
    %c0_21 = arith.constant 0 : index
    %c124_22 = arith.constant 124 : index
    %34 = vector.load %arg8[%c0_20, %c0_21, %c124_22] : memref<1x4x128xf32, #tpu.memory_space<vmem>>, vector<1x4x4xf32>
    %35 = vector.shape_cast %34 : vector<1x4x4xf32> to vector<4x4xf32>
    %c0_23 = arith.constant 0 : index
    %c0_24 = arith.constant 0 : index
    %c0_25 = arith.constant 0 : index
    %36 = vector.load %arg10[%c0_23, %c0_24, %c0_25] : memref<1x4x128xf32, #tpu.memory_space<vmem>>, vector<1x4x4xf32>
    %37 = vector.shape_cast %36 : vector<1x4x4xf32> to vector<4x4xf32>
    %38 = tpu.iota {dimensions = array<i32: 1>} : vector<4x4xi32>
    %c4_i32_26 = arith.constant 4 : i32
    %39 = arith.subi %0, %c4_i32_26 : i32
    %40 = vector.broadcast %39 : i32 to vector<4x4xi32>
    %41 = arith.addi %38, %40 : vector<4x4xi32>
    %42 = tpu.iota {dimensions = array<i32: 1>} : vector<4x4xi32>
    %c256_i32_27 = arith.constant 256 : i32
    %43 = arith.addi %0, %c256_i32_27 : i32
    %44 = vector.broadcast %43 : i32 to vector<4x4xi32>
    %45 = arith.addi %42, %44 : vector<4x4xi32>
    %c0_i32_28 = arith.constant 0 : i32
    %46 = vector.broadcast %c0_i32_28 : i32 to vector<4x4xi32>
    %47 = arith.cmpi sge, %41, %46 : vector<4x4xi32>
    %cst_29 = arith.constant 0.000000e+00 : f32
    %48 = vector.broadcast %cst_29 : f32 to vector<4x4xf32>
    %49 = arith.select %47, %35, %48 : vector<4x4xi1>, vector<4x4xf32>
    %c512_i32_30 = arith.constant 512 : i32
    %50 = vector.broadcast %c512_i32_30 : i32 to vector<4x4xi32>
    %51 = arith.cmpi slt, %45, %50 : vector<4x4xi32>
    %cst_31 = arith.constant 0.000000e+00 : f32
    %52 = vector.broadcast %cst_31 : f32 to vector<4x4xf32>
    %53 = arith.select %51, %37, %52 : vector<4x4xi1>, vector<4x4xf32>
    %c0_32 = arith.constant 0 : index
    %c0_33 = arith.constant 0 : index
    %c0_34 = arith.constant 0 : index
    %54 = vector.load %arg9[%c0_32, %c0_33, %c0_34] : memref<1x4x256xf32, #tpu.memory_space<vmem>>, vector<1x4x256xf32>
    %55 = vector.shape_cast %54 : vector<1x4x256xf32> to vector<4x256xf32>
    %56 = tpu.concatenate %49, %55, %53 in 1 : vector<4x4xf32>, vector<4x256xf32>, vector<4x4xf32> -> vector<4x264xf32>
    %57 = arith.addf %33, %56 : vector<4x264xf32>
    %cst_35 = arith.constant 0.000000e+00 : f32
    %58 = vector.broadcast %cst_35 : f32 to vector<4x264xf32>
    %59 = arith.cmpf oge, %57, %58 : vector<4x264xf32>
    %cst_36 = arith.constant 2.000000e-01 : f32
    %60 = vector.broadcast %cst_36 : f32 to vector<4x264xf32>
    %61 = arith.mulf %60, %57 : vector<4x264xf32>
    %62 = arith.select %59, %57, %61 : vector<4x264xi1>, vector<4x264xf32>
    %c0_37 = arith.constant 0 : index
    %c0_38 = arith.constant 0 : index
    %63 = vector.load %arg18[%c0_37, %c0_38] : memref<4x12xf32, #tpu.memory_space<vmem>>, vector<4x12xf32>
    %c0_39 = arith.constant 0 : index
    %c0_40 = arith.constant 0 : index
    %64 = vector.load %arg19[%c0_39, %c0_40] : memref<4x1xf32, #tpu.memory_space<vmem>>, vector<4x1xf32>
    %65 = vector.extract_strided_slice %62 {offsets = [0, 0], sizes = [4, 260], strides = [1, 1]} : vector<4x264xf32> to vector<4x260xf32>
    %66 = vector.extract_strided_slice %63 {offsets = [0, 0], sizes = [4, 4], strides = [1, 1]} : vector<4x12xf32> to vector<4x4xf32>
    %cst_41 = arith.constant dense<0.000000e+00> : vector<4x260xf32>
    %67 = tpu.matmul %66, %65, %cst_41 {dimension_numbers = #tpu.dot_dimension_numbers<[1], [0], [0], [1], [0, 0, 1, 1], [], []>} : vector<4x4xf32>, vector<4x260xf32>, vector<4x260xf32> -> vector<4x260xf32>
    %68 = vector.extract_strided_slice %62 {offsets = [0, 2], sizes = [4, 260], strides = [1, 1]} : vector<4x264xf32> to vector<4x260xf32>
    %69 = vector.extract_strided_slice %63 {offsets = [0, 4], sizes = [4, 4], strides = [1, 1]} : vector<4x12xf32> to vector<4x4xf32>
    %cst_42 = arith.constant dense<0.000000e+00> : vector<4x260xf32>
    %70 = tpu.matmul %69, %68, %cst_42 {dimension_numbers = #tpu.dot_dimension_numbers<[1], [0], [0], [1], [0, 0, 1, 1], [], []>} : vector<4x4xf32>, vector<4x260xf32>, vector<4x260xf32> -> vector<4x260xf32>
    %71 = arith.addf %67, %70 : vector<4x260xf32>
    %72 = vector.extract_strided_slice %62 {offsets = [0, 4], sizes = [4, 260], strides = [1, 1]} : vector<4x264xf32> to vector<4x260xf32>
    %73 = vector.extract_strided_slice %63 {offsets = [0, 8], sizes = [4, 4], strides = [1, 1]} : vector<4x12xf32> to vector<4x4xf32>
    %cst_43 = arith.constant dense<0.000000e+00> : vector<4x260xf32>
    %74 = tpu.matmul %73, %72, %cst_43 {dimension_numbers = #tpu.dot_dimension_numbers<[1], [0], [0], [1], [0, 0, 1, 1], [], []>} : vector<4x4xf32>, vector<4x260xf32>, vector<4x260xf32> -> vector<4x260xf32>
    %75 = arith.addf %71, %74 : vector<4x260xf32>
    %76 = vector.broadcast %64 : vector<4x1xf32> to vector<4x260xf32>
    %77 = arith.addf %75, %76 : vector<4x260xf32>
    %c0_44 = arith.constant 0 : index
    %c0_45 = arith.constant 0 : index
    %c126_46 = arith.constant 126 : index
    %78 = vector.load %arg11[%c0_44, %c0_45, %c126_46] : memref<1x4x128xf32, #tpu.memory_space<vmem>>, vector<1x4x2xf32>
    %79 = vector.shape_cast %78 : vector<1x4x2xf32> to vector<4x2xf32>
    %c0_47 = arith.constant 0 : index
    %c0_48 = arith.constant 0 : index
    %c0_49 = arith.constant 0 : index
    %80 = vector.load %arg13[%c0_47, %c0_48, %c0_49] : memref<1x4x128xf32, #tpu.memory_space<vmem>>, vector<1x4x2xf32>
    %81 = vector.shape_cast %80 : vector<1x4x2xf32> to vector<4x2xf32>
    %82 = tpu.iota {dimensions = array<i32: 1>} : vector<4x2xi32>
    %c2_i32 = arith.constant 2 : i32
    %83 = arith.subi %0, %c2_i32 : i32
    %84 = vector.broadcast %83 : i32 to vector<4x2xi32>
    %85 = arith.addi %82, %84 : vector<4x2xi32>
    %86 = tpu.iota {dimensions = array<i32: 1>} : vector<4x2xi32>
    %c256_i32_50 = arith.constant 256 : i32
    %87 = arith.addi %0, %c256_i32_50 : i32
    %88 = vector.broadcast %87 : i32 to vector<4x2xi32>
    %89 = arith.addi %86, %88 : vector<4x2xi32>
    %c0_i32_51 = arith.constant 0 : i32
    %90 = vector.broadcast %c0_i32_51 : i32 to vector<4x2xi32>
    %91 = arith.cmpi sge, %85, %90 : vector<4x2xi32>
    %cst_52 = arith.constant 0.000000e+00 : f32
    %92 = vector.broadcast %cst_52 : f32 to vector<4x2xf32>
    %93 = arith.select %91, %79, %92 : vector<4x2xi1>, vector<4x2xf32>
    %c512_i32_53 = arith.constant 512 : i32
    %94 = vector.broadcast %c512_i32_53 : i32 to vector<4x2xi32>
    %95 = arith.cmpi slt, %89, %94 : vector<4x2xi32>
    %cst_54 = arith.constant 0.000000e+00 : f32
    %96 = vector.broadcast %cst_54 : f32 to vector<4x2xf32>
    %97 = arith.select %95, %81, %96 : vector<4x2xi1>, vector<4x2xf32>
    %c0_55 = arith.constant 0 : index
    %c0_56 = arith.constant 0 : index
    %c0_57 = arith.constant 0 : index
    %98 = vector.load %arg12[%c0_55, %c0_56, %c0_57] : memref<1x4x256xf32, #tpu.memory_space<vmem>>, vector<1x4x256xf32>
    %99 = vector.shape_cast %98 : vector<1x4x256xf32> to vector<4x256xf32>
    %100 = tpu.concatenate %93, %99, %97 in 1 : vector<4x2xf32>, vector<4x256xf32>, vector<4x2xf32> -> vector<4x260xf32>
    %101 = arith.mulf %100, %77 : vector<4x260xf32>
    %c0_58 = arith.constant 0 : index
    %c0_59 = arith.constant 0 : index
    %c126_60 = arith.constant 126 : index
    %102 = vector.load %arg14[%c0_58, %c0_59, %c126_60] : memref<1x4x128xf32, #tpu.memory_space<vmem>>, vector<1x4x2xf32>
    %103 = vector.shape_cast %102 : vector<1x4x2xf32> to vector<4x2xf32>
    %c0_61 = arith.constant 0 : index
    %c0_62 = arith.constant 0 : index
    %c0_63 = arith.constant 0 : index
    %104 = vector.load %arg16[%c0_61, %c0_62, %c0_63] : memref<1x4x128xf32, #tpu.memory_space<vmem>>, vector<1x4x2xf32>
    %105 = vector.shape_cast %104 : vector<1x4x2xf32> to vector<4x2xf32>
    %106 = tpu.iota {dimensions = array<i32: 1>} : vector<4x2xi32>
    %c2_i32_64 = arith.constant 2 : i32
    %107 = arith.subi %0, %c2_i32_64 : i32
    %108 = vector.broadcast %107 : i32 to vector<4x2xi32>
    %109 = arith.addi %106, %108 : vector<4x2xi32>
    %110 = tpu.iota {dimensions = array<i32: 1>} : vector<4x2xi32>
    %c256_i32_65 = arith.constant 256 : i32
    %111 = arith.addi %0, %c256_i32_65 : i32
    %112 = vector.broadcast %111 : i32 to vector<4x2xi32>
    %113 = arith.addi %110, %112 : vector<4x2xi32>
    %c0_i32_66 = arith.constant 0 : i32
    %114 = vector.broadcast %c0_i32_66 : i32 to vector<4x2xi32>
    %115 = arith.cmpi sge, %109, %114 : vector<4x2xi32>
    %cst_67 = arith.constant 0.000000e+00 : f32
    %116 = vector.broadcast %cst_67 : f32 to vector<4x2xf32>
    %117 = arith.select %115, %103, %116 : vector<4x2xi1>, vector<4x2xf32>
    %c512_i32_68 = arith.constant 512 : i32
    %118 = vector.broadcast %c512_i32_68 : i32 to vector<4x2xi32>
    %119 = arith.cmpi slt, %113, %118 : vector<4x2xi32>
    %cst_69 = arith.constant 0.000000e+00 : f32
    %120 = vector.broadcast %cst_69 : f32 to vector<4x2xf32>
    %121 = arith.select %119, %105, %120 : vector<4x2xi1>, vector<4x2xf32>
    %c0_70 = arith.constant 0 : index
    %c0_71 = arith.constant 0 : index
    %c0_72 = arith.constant 0 : index
    %122 = vector.load %arg15[%c0_70, %c0_71, %c0_72] : memref<1x4x256xf32, #tpu.memory_space<vmem>>, vector<1x4x256xf32>
    %123 = vector.shape_cast %122 : vector<1x4x256xf32> to vector<4x256xf32>
    %124 = tpu.concatenate %117, %123, %121 in 1 : vector<4x2xf32>, vector<4x256xf32>, vector<4x2xf32> -> vector<4x260xf32>
    %125 = arith.addf %101, %124 : vector<4x260xf32>
    %cst_73 = arith.constant 0.000000e+00 : f32
    %126 = vector.broadcast %cst_73 : f32 to vector<4x260xf32>
    %127 = arith.cmpf oge, %125, %126 : vector<4x260xf32>
    %cst_74 = arith.constant 2.000000e-01 : f32
    %128 = vector.broadcast %cst_74 : f32 to vector<4x260xf32>
    %129 = arith.mulf %128, %125 : vector<4x260xf32>
    %130 = arith.select %127, %125, %129 : vector<4x260xi1>, vector<4x260xf32>
    %c0_75 = arith.constant 0 : index
    %c0_76 = arith.constant 0 : index
    %131 = vector.load %arg20[%c0_75, %c0_76] : memref<8x12xf32, #tpu.memory_space<vmem>>, vector<8x12xf32>
    %c0_77 = arith.constant 0 : index
    %c0_78 = arith.constant 0 : index
    %132 = vector.load %arg21[%c0_77, %c0_78] : memref<8x1xf32, #tpu.memory_space<vmem>>, vector<8x1xf32>
    %133 = vector.extract_strided_slice %130 {offsets = [0, 0], sizes = [4, 256], strides = [1, 1]} : vector<4x260xf32> to vector<4x256xf32>
    %134 = vector.extract_strided_slice %131 {offsets = [0, 0], sizes = [8, 4], strides = [1, 1]} : vector<8x12xf32> to vector<8x4xf32>
    %cst_79 = arith.constant dense<0.000000e+00> : vector<8x256xf32>
    %135 = tpu.matmul %134, %133, %cst_79 {dimension_numbers = #tpu.dot_dimension_numbers<[1], [0], [0], [1], [0, 0, 1, 1], [], []>} : vector<8x4xf32>, vector<4x256xf32>, vector<8x256xf32> -> vector<8x256xf32>
    %136 = vector.extract_strided_slice %130 {offsets = [0, 2], sizes = [4, 256], strides = [1, 1]} : vector<4x260xf32> to vector<4x256xf32>
    %137 = vector.extract_strided_slice %131 {offsets = [0, 4], sizes = [8, 4], strides = [1, 1]} : vector<8x12xf32> to vector<8x4xf32>
    %cst_80 = arith.constant dense<0.000000e+00> : vector<8x256xf32>
    %138 = tpu.matmul %137, %136, %cst_80 {dimension_numbers = #tpu.dot_dimension_numbers<[1], [0], [0], [1], [0, 0, 1, 1], [], []>} : vector<8x4xf32>, vector<4x256xf32>, vector<8x256xf32> -> vector<8x256xf32>
    %139 = arith.addf %135, %138 : vector<8x256xf32>
    %140 = vector.extract_strided_slice %130 {offsets = [0, 4], sizes = [4, 256], strides = [1, 1]} : vector<4x260xf32> to vector<4x256xf32>
    %141 = vector.extract_strided_slice %131 {offsets = [0, 8], sizes = [8, 4], strides = [1, 1]} : vector<8x12xf32> to vector<8x4xf32>
    %cst_81 = arith.constant dense<0.000000e+00> : vector<8x256xf32>
    %142 = tpu.matmul %141, %140, %cst_81 {dimension_numbers = #tpu.dot_dimension_numbers<[1], [0], [0], [1], [0, 0, 1, 1], [], []>} : vector<8x4xf32>, vector<4x256xf32>, vector<8x256xf32> -> vector<8x256xf32>
    %143 = arith.addf %139, %142 : vector<8x256xf32>
    %144 = vector.broadcast %132 : vector<8x1xf32> to vector<8x256xf32>
    %145 = arith.addf %143, %144 : vector<8x256xf32>
    %c0_82 = arith.constant 0 : index
    %c0_83 = arith.constant 0 : index
    %c0_84 = arith.constant 0 : index
    %146 = vector.load %arg22[%c0_82, %c0_83, %c0_84] : memref<1x8x256xf32, #tpu.memory_space<vmem>>, vector<1x8x256xf32>
    %147 = vector.shape_cast %146 : vector<1x8x256xf32> to vector<8x256xf32>
    %148 = vector.shape_cast %145 : vector<8x256xf32> to vector<1x8x256xf32>
    tpu.vector_store %arg22[%c0_82, %c0_83, %c0_84], %148 {strides = array<i32>} : memref<1x8x256xf32, #tpu.memory_space<vmem>>, vector<1x8x256xf32>,
    return
  }
  func.func @transform_0(%arg0: i32, %arg1: i32) -> (i32, i32, i32) {
    %c1_i32 = arith.constant 1 : i32
    %0 = arith.muli %arg1, %c1_i32 : i32
    %c1_i32_0 = arith.constant 1 : i32
    %1 = arith.subi %0, %c1_i32_0 : i32
    %c0_i32 = arith.constant 0 : i32
    %2 = arith.maxsi %1, %c0_i32 : i32
    %c0_i32_1 = arith.constant 0 : i32
    %c0_i32_2 = arith.constant 0 : i32
    return %arg0, %c0_i32_1, %2 : i32, i32, i32
  }
  func.func @transform_1(%arg0: i32, %arg1: i32) -> (i32, i32, i32) {
    %c0_i32 = arith.constant 0 : i32
    %c0_i32_0 = arith.constant 0 : i32
    return %arg0, %c0_i32, %arg1 : i32, i32, i32
  }
  func.func @transform_2(%arg0: i32, %arg1: i32) -> (i32, i32, i32) {
    %c1_i32 = arith.constant 1 : i32
    %0 = arith.muli %arg1, %c1_i32 : i32
    %c1_i32_0 = arith.constant 1 : i32
    %1 = arith.addi %0, %c1_i32_0 : i32
    %c1_i32_1 = arith.constant 1 : i32
    %2 = arith.minsi %1, %c1_i32_1 : i32
    %c0_i32 = arith.constant 0 : i32
    %c0_i32_2 = arith.constant 0 : i32
    return %arg0, %c0_i32, %2 : i32, i32, i32
  }
  func.func @transform_3(%arg0: i32, %arg1: i32) -> (i32, i32, i32) {
    %c2_i32 = arith.constant 2 : i32
    %0 = arith.muli %arg1, %c2_i32 : i32
    %c1_i32 = arith.constant 1 : i32
    %1 = arith.subi %0, %c1_i32 : i32
    %c0_i32 = arith.constant 0 : i32
    %2 = arith.maxsi %1, %c0_i32 : i32
    %c0_i32_0 = arith.constant 0 : i32
    %c0_i32_1 = arith.constant 0 : i32
    return %arg0, %c0_i32_0, %2 : i32, i32, i32
  }
  func.func @transform_4(%arg0: i32, %arg1: i32) -> (i32, i32, i32) {
    %c0_i32 = arith.constant 0 : i32
    %c0_i32_0 = arith.constant 0 : i32
    return %arg0, %c0_i32, %arg1 : i32, i32, i32
  }
  func.func @transform_5(%arg0: i32, %arg1: i32) -> (i32, i32, i32) {
    %c2_i32 = arith.constant 2 : i32
    %0 = arith.muli %arg1, %c2_i32 : i32
    %c2_i32_0 = arith.constant 2 : i32
    %1 = arith.addi %0, %c2_i32_0 : i32
    %c3_i32 = arith.constant 3 : i32
    %2 = arith.minsi %1, %c3_i32 : i32
    %c0_i32 = arith.constant 0 : i32
    %c0_i32_1 = arith.constant 0 : i32
    return %arg0, %c0_i32, %2 : i32, i32, i32
  }
  func.func @transform_6(%arg0: i32, %arg1: i32) -> (i32, i32, i32) {
    %c2_i32 = arith.constant 2 : i32
    %0 = arith.muli %arg1, %c2_i32 : i32
    %c1_i32 = arith.constant 1 : i32
    %1 = arith.subi %0, %c1_i32 : i32
    %c0_i32 = arith.constant 0 : i32
    %2 = arith.maxsi %1, %c0_i32 : i32
    %c0_i32_0 = arith.constant 0 : i32
    %c0_i32_1 = arith.constant 0 : i32
    return %arg0, %c0_i32_0, %2 : i32, i32, i32
  }
  func.func @transform_7(%arg0: i32, %arg1: i32) -> (i32, i32, i32) {
    %c0_i32 = arith.constant 0 : i32
    %c0_i32_0 = arith.constant 0 : i32
    return %arg0, %c0_i32, %arg1 : i32, i32, i32
  }
  func.func @transform_8(%arg0: i32, %arg1: i32) -> (i32, i32, i32) {
    %c2_i32 = arith.constant 2 : i32
    %0 = arith.muli %arg1, %c2_i32 : i32
    %c2_i32_0 = arith.constant 2 : i32
    %1 = arith.addi %0, %c2_i32_0 : i32
    %c3_i32 = arith.constant 3 : i32
    %2 = arith.minsi %1, %c3_i32 : i32
    %c0_i32 = arith.constant 0 : i32
    %c0_i32_1 = arith.constant 0 : i32
    return %arg0, %c0_i32, %2 : i32, i32, i32
  }
  func.func @transform_9(%arg0: i32, %arg1: i32) -> (i32, i32, i32) {
    %c2_i32 = arith.constant 2 : i32
    %0 = arith.muli %arg1, %c2_i32 : i32
    %c1_i32 = arith.constant 1 : i32
    %1 = arith.subi %0, %c1_i32 : i32
    %c0_i32 = arith.constant 0 : i32
    %2 = arith.maxsi %1, %c0_i32 : i32
    %c0_i32_0 = arith.constant 0 : i32
    %c0_i32_1 = arith.constant 0 : i32
    return %arg0, %c0_i32_0, %2 : i32, i32, i32
  }
  func.func @transform_10(%arg0: i32, %arg1: i32) -> (i32, i32, i32) {
    %c0_i32 = arith.constant 0 : i32
    %c0_i32_0 = arith.constant 0 : i32
    return %arg0, %c0_i32, %arg1 : i32, i32, i32
  }
  func.func @transform_11(%arg0: i32, %arg1: i32) -> (i32, i32, i32) {
    %c2_i32 = arith.constant 2 : i32
    %0 = arith.muli %arg1, %c2_i32 : i32
    %c2_i32_0 = arith.constant 2 : i32
    %1 = arith.addi %0, %c2_i32_0 : i32
    %c3_i32 = arith.constant 3 : i32
    %2 = arith.minsi %1, %c3_i32 : i32
    %c0_i32 = arith.constant 0 : i32
    %c0_i32_1 = arith.constant 0 : i32
    return %arg0, %c0_i32, %2 : i32, i32, i32
  }
  func.func @transform_12(%arg0: i32, %arg1: i32) -> (i32, i32, i32) {
    %c2_i32 = arith.constant 2 : i32
    %0 = arith.muli %arg1, %c2_i32 : i32
    %c1_i32 = arith.constant 1 : i32
    %1 = arith.subi %0, %c1_i32 : i32
    %c0_i32 = arith.constant 0 : i32
    %2 = arith.maxsi %1, %c0_i32 : i32
    %c0_i32_0 = arith.constant 0 : i32
    %c0_i32_1 = arith.constant 0 : i32
    return %arg0, %c0_i32_0, %2 : i32, i32, i32
  }
  func.func @transform_13(%arg0: i32, %arg1: i32) -> (i32, i32, i32) {
    %c0_i32 = arith.constant 0 : i32
    %c0_i32_0 = arith.constant 0 : i32
    return %arg0, %c0_i32, %arg1 : i32, i32, i32
  }
  func.func @transform_14(%arg0: i32, %arg1: i32) -> (i32, i32, i32) {
    %c2_i32 = arith.constant 2 : i32
    %0 = arith.muli %arg1, %c2_i32 : i32
    %c2_i32_0 = arith.constant 2 : i32
    %1 = arith.addi %0, %c2_i32_0 : i32
    %c3_i32 = arith.constant 3 : i32
    %2 = arith.minsi %1, %c3_i32 : i32
    %c0_i32 = arith.constant 0 : i32
    %c0_i32_1 = arith.constant 0 : i32
    return %arg0, %c0_i32, %2 : i32, i32, i32
  }
  func.func @transform_15(%arg0: i32, %arg1: i32) -> (i32, i32) {
    %c0_i32 = arith.constant 0 : i32
    %c0_i32_0 = arith.constant 0 : i32
    %c0_i32_1 = arith.constant 0 : i32
    return %c0_i32, %c0_i32_0 : i32, i32
  }
  func.func @transform_16(%arg0: i32, %arg1: i32) -> (i32, i32) {
    %c0_i32 = arith.constant 0 : i32
    %c0_i32_0 = arith.constant 0 : i32
    %c0_i32_1 = arith.constant 0 : i32
    return %c0_i32, %c0_i32_0 : i32, i32
  }
  func.func @transform_17(%arg0: i32, %arg1: i32) -> (i32, i32) {
    %c0_i32 = arith.constant 0 : i32
    %c0_i32_0 = arith.constant 0 : i32
    %c0_i32_1 = arith.constant 0 : i32
    return %c0_i32, %c0_i32_0 : i32, i32
  }
  func.func @transform_18(%arg0: i32, %arg1: i32) -> (i32, i32) {
    %c0_i32 = arith.constant 0 : i32
    %c0_i32_0 = arith.constant 0 : i32
    %c0_i32_1 = arith.constant 0 : i32
    return %c0_i32, %c0_i32_0 : i32, i32
  }
  func.func @transform_19(%arg0: i32, %arg1: i32) -> (i32, i32) {
    %c0_i32 = arith.constant 0 : i32
    %c0_i32_0 = arith.constant 0 : i32
    %c0_i32_1 = arith.constant 0 : i32
    return %c0_i32, %c0_i32_0 : i32, i32
  }
  func.func @transform_20(%arg0: i32, %arg1: i32) -> (i32, i32, i32) {
    %c0_i32 = arith.constant 0 : i32
    %c0_i32_0 = arith.constant 0 : i32
    return %arg0, %c0_i32, %arg1 : i32, i32, i32
  }
}

</mosaic_0001>

<bundles_post_ra>
// kernel: tpu_custom_call.1
= control target key start
LH: loop header
LB: loop body
LE: loop exit
PB: predicated region body
PF: predicated region fallthrough
CT: control target
= control target key end

     0   :  { %s5381_s0 = inlined_call_operand.hbm [shape: f32[2,4,256], index: 0, kind: input, shape index: {}]   ;;  %s5382_s1 = inlined_call_operand.hbm [shape: f32[2,4,256], index: 1, kind: input, shape index: {}]   ;;  %s5383_s2 = inlined_call_operand.hbm [shape: f32[2,4,256], index: 2, kind: input, shape index: {}]   ;;  %s5384_s3 = inlined_call_operand.hbm [shape: f32[2,4,512], index: 3, kind: input, shape index: {}]   ;;  %s5385_s4 = inlined_call_operand.hbm [shape: f32[2,4,512], index: 4, kind: input, shape index: {}]   ;;  %s5386_s5 = inlined_call_operand.vmem [shape: f32[2,4,512], index: 5, kind: input, shape index: {}]   ;;  %s5387_s6 = inlined_call_operand.hbm [shape: f32[2,4,512], index: 6, kind: input, shape index: {}]   ;;  %s5388_s7 = inlined_call_operand.hbm [shape: f32[2,4,512], index: 7, kind: input, shape index: {}]   ;;  %s5389_s8 = inlined_call_operand.hbm [shape: f32[2,4,512], index: 8, kind: input, shape index: {}]   ;;  %s5390_s9 = inlined_call_operand.hbm [shape: f32[2,4,512], index: 9, kind: input, shape index: {}]   ;;  %s5391_s10 = inlined_call_operand.hbm [shape: f32[2,4,512], index: 10, kind: input, shape index: {}]   ;;  %s5392_s11 = inlined_call_operand.hbm [shape: f32[2,4,512], index: 11, kind: input, shape index: {}]   ;;  %s5393_s12 = inlined_call_operand.hbm [shape: f32[2,4,512], index: 12, kind: input, shape index: {}]   ;;  %s5394_s13 = inlined_call_operand.hbm [shape: f32[2,4,512], index: 13, kind: input, shape index: {}]   ;;  %s5395_s14 = inlined_call_operand.vmem [shape: f32[2,4,512], index: 14, kind: input, shape index: {}]   ;;  %s5396_s15 = inlined_call_operand.hbm [shape: f32[132,264], index: 15, kind: input, shape index: {}]   ;;  %s5397_s16 = inlined_call_operand.hbm [shape: f32[4,12], index: 16, kind: input, shape index: {}]   ;;  %s5398_s17 = inlined_call_operand.vmem [shape: f32[4,1], index: 17, kind: input, shape index: {}]   ;;  %s5399_s18 = inlined_call_operand.vmem [shape: f32[8,12], index: 18, kind: input, shape index: {}]   ;;  %s5400_s19 = inlined_call_operand.vmem [shape: f32[8,1], index: 19, kind: input, shape index: {}]   ;;  %s5401_s20 = inlined_call_operand.hbm [shape: f32[2,8,512], index: 20, kind: output, shape index: {}]  }
   0x1   :  { %5481 = sst [smem:[#allocation73_spill]] %s5381_s0 }
   0x2   :  { %5482 = sst [smem:[#allocation74_spill]] %s5382_s1 }
   0x3   :  { %5483 = sst [smem:[#allocation75_spill]] %s5383_s2 }
   0x4   :  { %5484 = sst [smem:[#allocation76_spill]] %s5384_s3 }
   0x5   :  { %5485 = sst [smem:[#allocation77_spill]] %s5385_s4 }
   0x6   :  { %5486 = sst [smem:[#allocation78_spill]] %s5386_s5 }
   0x7   :  { %5487 = sst [smem:[#allocation79_spill]] %s5387_s6 }
   0x8   :  { %5488 = sst [smem:[#allocation80_spill]] %s5388_s7 }
   0x9   :  { %5489 = sst [smem:[#allocation81_spill]] %s5389_s8 }
   0xa   :  { %5490 = sst [smem:[#allocation82_spill]] %s5390_s9 }
   0xb   :  { %5491 = sst [smem:[#allocation83_spill]] %s5391_s10 }
   0xc   :  { %5492 = sst [smem:[#allocation84_spill]] %s5392_s11 }
   0xd   :  { %5493 = sst [smem:[#allocation85_spill]] %s5393_s12 }
   0xe   :  { %5494 = sst [smem:[#allocation86_spill]] %s5394_s13 }
   0xf   :  { %5495 = sst [smem:[#allocation87_spill]] %s5395_s14 }
  0x10   :  { %5496 = sst [smem:[#allocation88_spill]] %s5396_s15 }
  0x11   :  { %5497 = sst [smem:[#allocation89_spill]] %s5397_s16 }
  0x12   :  { %5498 = sst [smem:[#allocation90_spill]] %s5398_s17 }
  0x13   :  { %5499 = sst [smem:[#allocation91_spill]] %s5399_s18 }
  0x14   :  { %5500 = sst [smem:[#allocation92_spill]] %s5400_s19 }
  0x15   :  { %5501 = sst [smem:[#allocation93_spill]] %s5401_s20 }
  0x16   :  { %25 = vsyncpa [#allocation3], 0 }
  0x17   :  { %27 = vsyncpa [#allocation3 + $0x1], 0 }
  0x18   :  { %28 = vsyncpa [#allocation6], 0 }
  0x19   :  { %30 = vsyncpa [#allocation6 + $0x1], 0 }
  0x1a   :  { %31 = vsyncpa [#allocation9], 0 }
  0x1b   :  { %33 = vsyncpa [#allocation9 + $0x1], 0 }
  0x1c   :  { %34 = vsyncpa [#allocation12], 0 }
  0x1d   :  { %36 = vsyncpa [#allocation12 + $0x1], 0 }
  0x1e   :  { %37 = vsyncpa [#allocation15], 0 }
  0x1f   :  { %39 = vsyncpa [#allocation15 + $0x1], 0 }
  0x20   :  { %40 = vsyncpa [#allocation18], 0 }
  0x21   :  { %42 = vsyncpa [#allocation18 + $0x1], 0 }
  0x22   :  { %43 = vsyncpa [#allocation21], 0 }
  0x23   :  { %45 = vsyncpa [#allocation21 + $0x1], 0 }
  0x24   :  { %46 = vsyncpa [#allocation24], 0 }
  0x25   :  { %47 = vsyncpa [#allocation4], 0 }
  0x26   :  { %49 = vsyncpa [#allocation4 + $0x1], 0  ;;  %s4251_s1 = smov 0   ;;  %s4253_s22 = smov 0  }
  0x27   :  { %s4255_s23 = smov 0   ;;  %s4257_s24 = smov 0  }
  0x28   :  { %s4259_s2 = smov 0   ;;  %s4261_s25 = smov 0  }
  0x29   :  { %s4263_s3 = smov 0   ;;  %s4265_s26 = smov 0  }
  0x2a   :  { %s4267_s27 = smov 0   ;;  %s4269_s28 = smov 0  }
  0x2b   :  { %s4271_s4 = smov 0   ;;  %s4273_s29 = smov 0  }
  0x2c   :  { %s4275_s30 = smov 0   ;;  %s4277_s0 = smov 0  }
  0x2d   :  { %s4279_s21 = smov 0   ;;  %s4281_s20 = smov 0  }
  0x2e   :  { %s4283_s19 = smov 0   ;;  %s4285_s18 = smov 0  }
  0x2f   :  { %s4287_s14 = smov 0   ;;  %s4289_s17 = smov 0  }
  0x30 LB: > { %5502 = sst [smem:[#allocation42_spill]] %s4045_s22  ;;  %s4350_s5 = sadd.s32 4294967295, %s4117_s17   ;;  %s4117_s17 = sphi %s4289_s17, %s55_s17   ;;  %s4113_s14 = sphi %s4287_s14, %s5657_s14   ;;  %s4109_s18 = sphi %s4285_s18, %s5651_s18   ;;  %s4105_s19 = sphi %s4283_s19, %s5656_s19   ;;  %s4101_s20 = sphi %s4281_s20, %s5649_s20   ;;  %s4097_s21 = sphi %s4279_s21, %s5655_s21   ;;  %s4093_s0 = sphi %s4277_s0, %s5647_s0   ;;  %s4089_s30 = sphi %s4275_s30, %s5646_s30   ;;  %s4085_s29 = sphi %s4273_s29, %s5645_s29   ;;  %s4081_s4 = sphi %s4271_s4, %s5644_s4   ;;  %s4077_s28 = sphi %s4269_s28, %s5643_s28   ;;  %s4073_s27 = sphi %s4267_s27, %s5642_s27   ;;  %s4069_s26 = sphi %s4265_s26, %s5641_s26   ;;  %s4065_s3 = sphi %s4263_s3, %s5640_s3   ;;  %s4061_s25 = sphi %s4261_s25, %s5654_s25   ;;  %s4057_s2 = sphi %s4259_s2, %s5638_s2   ;;  %s4053_s24 = sphi %s4257_s24, %s5637_s24   ;;  %s4049_s23 = sphi %s4255_s23, %s5652_s23   ;;  %s4045_s22 = sphi %s4253_s22, %s5650_s22   ;;  %s4041_s1 = sphi %s4251_s1, %s5635_s1  }
  0x31   : > { %5503 = sst [smem:[#allocation43_spill]] %s4057_s2  ;;  %s67_s13 = sadd.s32 1, %s4113_s14 }
  0x32   : > { %5504 = sst [smem:[#allocation44_spill]] %s4061_s25  ;;  %s82_s11 = sadd.s32 1, %s4097_s21 }
  0x33   : > { %5505 = sst [smem:[#allocation45_spill]] %s4069_s26  ;;  %p89_p2 = scmp.ne.s32.totalorder %s4097_s21, %s4093_s0 }
  0x34   : > { %5506 = sst [smem:[#allocation46_spill]] %s4073_s27  ;;  %p90_p3 = scmp.eq.s32.totalorder %s4117_s17, 0 }
  0x35   : > { %5507 = sst [smem:[#allocation47_spill]] %s4077_s28  ;;  %p95_p4 = scmp.ne.s32.totalorder %s4093_s0, %s4089_s30 }
  0x36   : > { %5508 = sst [smem:[#allocation48_spill]] %s4081_s4  ;;  %p4371_p5 = por %p90_p3, %p89_p2 }
  0x37   : > { %5509 = sst [smem:[#allocation49_spill]] %s4085_s29  ;;  %p5434_p7 = scmp.eq.s32.totalorder %s4350_s5, 0 }
  0x38   : > { %5510 = sst [smem:[#allocation50_spill]] %s4093_s0  ;;  %s110_s7 = sadd.s32 1, %s4085_s29 }
  0x39   : > { %5511 = sst [smem:[#allocation51_spill]] %s4097_s21  ;;  %p4387_p8 = por %p5434_p7, %p95_p4 }
  0x3a   : > { %5512 = sst [smem:[#allocation52_spill]] %s4101_s20  ;;  %p5430_p10 = scmp.ne.s32.totalorder %s4085_s29, %s4081_s4 }
  0x3b   : > { %5513 = sst [smem:[#allocation53_spill]] %s4105_s19  ;;  %s64_s19 = sadd.s32 1, %s4109_s18 }
  0x3c   : > { %5514 = sst [smem:[#allocation54_spill]] %s4109_s18  ;;  %p65_p0 = scmp.ge.s32.totalorder %s64_s19, 2 }
  0x3d   : > { %5515 = sst [smem:[#allocation55_spill]] %s4350_s5  ;;  %p5426_p11 = scmp.ne.s32.totalorder %s4081_s4, %s4077_s28 }
  0x3e   : > { %s5659_s19 = smov (%p65_p0, %s64_s19), 0  ;;  %s5661_s13 = smov (!%p65_p0, %s67_s13), %s4113_s14 }
  0x3f   : > { %5516 = sst [smem:[#allocation56_spill]] %s5659_s19  ;;  %p69_p1 = scmp.ge.s32.totalorder %s5661_s13, 2 }
  0x40   : > { %s5518_s9 = scalar_select %p4371_p5, 1, 0 }
  0x41   : > { %s5663_s13 = smov (%p69_p1, %s5661_s13), 0  ;;  %p4404_p12 = por %p5430_p10, %p90_p3 }
  0x42   : > { %5517 = sst [smem:[#allocation57_spill]] %s5663_s13  ;;  %s4365_s20 = ssub.s32 %s4113_s14, %s5663_s13 }
  0x43   : > { %5519 = sst [smem:[#allocation58_spill]] %s5518_s9  ;;  %p80_p6 = scmp.eq.s32.totalorder %s4365_s20, 0 }
  0x44   : > { %s106_s13 = ssub.s32 %s4109_s18, %s5659_s19  ;;  %p4413_p13 = por %p5426_p11, %p5434_p7 }
  0x45   : > { %s4383_s12 = scalar_select %p80_p6, %s4097_s21, %s82_s11  }
  0x46   : > { %s5521_s30 = scalar_select %p4387_p8, 1, 0 }
  0x47   : > { %5520 = sst [smem:[#allocation59_spill]] %s4383_s12  ;;  %s107_s0 = sor.u32 %s106_s13, %s4365_s20 }
  0x48   : > { %5522 = sst [smem:[#allocation60_spill]] %s5521_s30  ;;  %p108_p9 = scmp.eq.s32.totalorder %s107_s0, 0 }
  0x49   : > { %s5524_s11 = scalar_select %p4404_p12, 1, 0 }
  0x4a   : > { %s4397_s9 = scalar_select %p108_p9, %s4085_s29, %s110_s7  }
  0x4b   : > { %s5525_s13 = scalar_select %p4413_p13, 1, 0 }
  0x4c   : > { %5523 = sst [smem:[#allocation61_spill]] %s4397_s9  ;;  %s144_s0 = sadd.s32 1, %s4073_s27 }
  0x4d   : > { %5526 = sst [smem:[#allocation62_spill]] %s5525_s13  ;;  %p151_p0 = scmp.ne.s32.totalorder %s4073_s27, %s4069_s26 }
  0x4e   : > { %p157_p1 = scmp.ne.s32.totalorder %s4069_s26, %s4065_s3  ;;  %s4423_s7 = sshll.u32 %s4109_s18, 1 }
  0x4f   : > { %p4427_p2 = por %p151_p0, %p90_p3  ;;  %s2983_s13 = sadd.s32 4294967295, %s4423_s7 }
  0x50   : > { %p4433_p4 = por %p157_p1, %p5434_p7  ;;  %p169_p9 = scmp.gt.s32.totalorder %s2983_s13, 0 }
  0x51   : > { %s5527_s12 = scalar_select %p4427_p2, 1, 0 }
  0x52   : > { %s5529_s9 = scalar_select %p4433_p4, 1, 0 }
  0x53   : > { %5528 = sst [smem:[#allocation63_spill]] %s5527_s12  ;;  %s2984_s3 = sshll.u32 %s5659_s19, 1 }
  0x54   : > { %5530 = sst [smem:[#allocation64_spill]] %s5529_s9  ;;  %s5665_s13 = smov (!%p169_p9, %s2983_s13), 0 }
  0x55   : > { %s4444_s26 = scalar_select %p80_p6, %s4073_s27, %s144_s0  }
  0x56   : > { %s2985_s30 = sadd.s32 4294967295, %s2984_s3  ;;  %s180_s21 = sadd.s32 1, %s4061_s25 }
  0x57   : > { %5531 = sst [smem:[#allocation65_spill]] %s4444_s26  ;;  %p173_p0 = scmp.gt.s32.totalorder %s2985_s30, 0 }
  0x58   : > { %p187_p11 = scmp.ne.s32.totalorder %s4061_s25, %s4057_s2  ;;  %p193_p1 = scmp.ne.s32.totalorder %s4057_s2, %s4053_s24 }
  0x59   : > { %s332_s9 = sadd.s32 2, %s4423_s7  ;;  %s5667_s30 = smov (!%p173_p0, %s2985_s30), 0 }
  0x5a   : > { %p4454_p9 = por %p187_p11, %p90_p3  ;;  %p4460_p6 = por %p193_p1, %p5434_p7 }
  0x5b   : > { %s176_s26 = ssub.s32 %s5665_s13, %s5667_s30  ;;  %p333_p10 = scmp.lt.s32.totalorder %s332_s9, 3 }
  0x5c   : > { %s5532_s19 = scalar_select %p4454_p9, 1, 0 }
  0x5d   : > { %s5533_s0 = scalar_select %p4460_p6, 1, 0 }
  0x5e   : > { %s177_s24 = sor.u32 %s176_s26, %s4365_s20  ;;  %s336_s2 = sadd.s32 2, %s2984_s3 }
  0x5f   : > { %5534 = sst [smem:[#allocation66_spill]] %s5533_s0  ;;  %p178_p0 = scmp.eq.s32.totalorder %s177_s24, 0 }
  0x60   : > { %p337_p11 = scmp.lt.s32.totalorder %s336_s2, 3  ;;  %s5669_s9 = smov (!%p333_p10, %s332_s9), 3 }
  0x61   : > { %s4469_s12 = scalar_select %p178_p0, %s4061_s25, %s180_s21  }
  0x62   : > { %s5671_s2 = smov (!%p337_p11, %s336_s2), 3  ;;  %s344_s30 = sadd.s32 1, %s4049_s23 }
  0x63   : > { %5535 = sst [smem:[#allocation67_spill]] %s4469_s12  ;;  %p351_p1 = scmp.ne.s32.totalorder %s4049_s23, %s4045_s22 }
  0x64   : > { %s340_s26 = ssub.s32 %s5669_s9, %s5671_s2  ;;  %p357_p7 = scmp.ne.s32.totalorder %s4045_s22, %s4041_s1 }
  0x65   : > { %s341_s3 = sor.u32 %s340_s26, %s4365_s20  ;;  %p4480_p6 = por %p351_p1, %p90_p3 }
  0x66   : > { %p342_p4 = scmp.eq.s32.totalorder %s341_s3, 0  ;;  %p5537_p10 = scmp.eq.s32.totalorder %s4350_s5, 0 }
  0x67   : > { %s5536_s24 = scalar_select %p4480_p6, 1, 0 }
  0x68   : > { %p4486_p13 = por %p357_p7, %p5537_p10  ;;  %p688_p0 = scmp.eq.s32.totalorder %s4350_s5, 3 }
  0x69   : > { %s5540_s21 = sadd.s32 4294967294, %s4117_s17   ;;  %p5542_p8 = scmp.ne.s32.totalorder %s4085_s29, %s4081_s4 }
  0x6a   : > { %s5538_s0 = scalar_select %p4486_p13, 1, 0 }
  0x6b   : > { %p694_p11 = scmp.eq.s32.totalorder %s5540_s21, 3  ;;  %p4499_p2 = por %p688_p0, %p5542_p8 }
  0x6c   : > { %5539 = sst [smem:[#allocation68_spill]] %s5538_s0  ;;  %p5545_p3 = scmp.ne.s32.totalorder %s4081_s4, %s4077_s28 }
  0x6d   : > { %s4494_s12 = scalar_select %p342_p4, %s4049_s23, %s344_s30  }
  0x6e   : > { %s5543_s20 = scalar_select %p4499_p2, 1, 0 }
  0x6f   : > { %5541 = sst [smem:[#allocation69_spill]] %s4494_s12  ;;  %p4506_p1 = por %p694_p11, %p5545_p3 }
  0x70   : > { %5544 = sst [smem:[#allocation70_spill]] %s5543_s20  ;;  %p3006_p5 = scmp.ge.s32.totalorder %s4117_s17, 1 }
  0x71   : > { %s5546_s1 = scalar_select %p4506_p1, 1, 0 }
  0x72   : > { %p701_p7 = scmp.lt.s32.totalorder %s4117_s17, 5  ;;  %s4119_s26 = smov [#allocation23]  }
  0x73   : > { %5547 = sst [smem:[#allocation71_spill]] %s5546_s1  ;;  %s713_s30 = sshll.u32 %s4119_s26, 4  ;;  %s714_s30 = int_to_ptr.vmem [resolvable:$true] %s713_s30 }
  0x74   : > { %p4512_p10 = pnand %p3006_p5, %p701_p7  ;;  %p5550_p4 = scmp.eq.s32.totalorder %s4350_s5, 0 }
  0x75   : > { %s4120_s21 = smov [#allocation25]   ;;  %s5552_s15 = sld [smem:[#allocation88_spill]] }
  0x76   : > { %s5548_s2 = scalar_select %p4512_p10, 1, 0 }
  0x77   : > { %p3252_p8 = pneg %p4512_p10  ;;  %s727_s12 = sshll.u32 %s4120_s21, 4  ;;  %s4524_s12 = int_to_ptr.vmem [resolvable:$true] %s727_s12 }
  0x78   : > { %5549 = sst [smem:[#allocation72_spill]] %s5548_s2 }
  0x79   : > { %p4520_p0 = pnand %p3252_p8, %p5550_p4 }
  0x7b   : > { %s3447_s20 = scalar_lea.hbm %s5552_s15, 6528  ;;  %p3449_p11 = pneg %p4520_p0 }
  0x7c   : > { %p3448_p5 = scmp.ne.s32.totalorder %s5552_s15, %s3447_s20  ;;  %p3454_p8 = scmp.lt.u32.totalorder %s3447_s20, %s5552_s15 }
  0x7e   : > { %p3450_p3 = pnand %p3449_p11, %p3448_p5 }
  0x80   : > { %p3451_p7 = pneg %p3450_p3 }
  0x82   : > { %p3456_p4 = pnand %p3454_p8, %p3451_p7 }
  0x84   : > { %3459 = shalt.err (!%p3456_p4)
}
  0x85   : > { %s3460_s21 = scalar_lea.vmem %s714_s30, 6528  ;;  %p3468_p10 = scmp.lt.s32.totalorder %s714_s30, %s714_s30 }
  0x86   : > { %p3461_p1 = scmp.ne.s32.totalorder %s714_s30, %s3460_s21  ;;  %p3469_p6 = scmp.lt.s32.totalorder %s3460_s21, %s3460_s21 }
  0x88   : > { %p3463_p2 = pnand %p3461_p1, %p3449_p11  ;;  %p3470_p9 = por %p3469_p6, %p3468_p10 }
  0x8a   : > { %p3464_p13 = pneg %p3463_p2 }
  0x8c   : > { %p3471_p12 = pnand %p3470_p9, %p3464_p13 }
  0x8e   : > { %3474 = shalt.err (!%p3471_p12)
}
  0x8f   : > { %s4121_s28 = smov 384   ;;  %s4122_s0 = smov 24  }
  0x90   : > { %3255 = dma.hbm_to_vmem [thread:$0]  (!%p4520_p0), %s5552_s15, 6528, %s714_s30, [#allocation24], %s4121_s28, %s4121_s28, %s4122_s0  }
  0x91   : > { %s5553_s16 = sld [smem:[#allocation89_spill]] }
  0x97   : > { %s3475_s26 = scalar_lea.hbm %s5553_s16, 64 }
  0x98   : > { %p3476_p2 = scmp.ne.s32.totalorder %s5553_s16, %s3475_s26  ;;  %p3482_p9 = scmp.lt.u32.totalorder %s3475_s26, %s5553_s16 }
  0x9a   : > { %p3478_p12 = pnand %p3476_p2, %p3449_p11 }
  0x9c   : > { %p3479_p13 = pneg %p3478_p12 }
  0x9e   : > { %p3484_p6 = pnand %p3482_p9, %p3479_p13 }
  0xa0   : > { %3487 = shalt.err (!%p3484_p6)
}
  0xa1   : > { %s3488_s30 = scalar_lea.vmem %s4524_s12, 64  ;;  %p3496_p3 = scmp.lt.s32.totalorder %s4524_s12, %s4524_s12 }
  0xa2   : > { %p3489_p1 = scmp.ne.s32.totalorder %s4524_s12, %s3488_s30  ;;  %p3497_p7 = scmp.lt.s32.totalorder %s3488_s30, %s3488_s30 }
  0xa4   : > { %p3491_p10 = pnand %p3489_p1, %p3449_p11  ;;  %p3498_p8 = por %p3497_p7, %p3496_p3 }
  0xa6   : > { %p3492_p5 = pneg %p3491_p10 }
  0xa8   : > { %p3499_p4 = pnand %p3498_p8, %p3492_p5 }
  0xaa   : > { %3502 = shalt.err (!%p3499_p4)
}
  0xab   : > { %3258 = dma.hbm_to_vmem [thread:$0]  (!%p4520_p0), %s5553_s16, 64, %s4524_s12, [#allocation24]  }
  0xac   : > { %p3009_p2 = scmp.ge.s32.totalorder %s4117_s17, 4 }
  0xad   : > { %s3012_s2 = sshll.u32 (!%p3009_p2), %s4113_s14, 1  ;;  %s4576_s28 = sand.u32 (!%p3009_p2), 1, %s4117_s17  }
  0xae   : > { %743 = sbr.rel (%p3009_p2) target bundleno = 549 (0x225), region = 36  ;;  %s772_s0 = sand.u32 (!%p3009_p2), 1, %s4085_s29  }
  0xaf   : > { %s3014_s22 = sshll.u32 (!%p3009_p2), %s772_s0, 2  ;;  %s779_s3 = sadd.s32 (!%p3009_p2), %s4109_s18, %s3012_s2 }
  0xb0   : > { %s3016_s4 = sshll.u32 (!%p3009_p2), %s779_s3, 6  ;;  %s5554_s26 = sld [smem:[#allocation74_spill]] (!%p3009_p2) }
  0xb1   : > { %s774_s21 = scalar_lea.vmem (!%p3009_p2), [#allocation5], %s3014_s22  ;;  %s4587_s27 = sshll.u32 (!%p3009_p2), %s772_s0, 3 }
  0xb2   : > { %s783_s30 = sshll.u32 (!%p3009_p2), %s774_s21, 4  ;;  %s5464_s15 = scalar_lea.sflag (!%p3009_p2), [#allocation6], %s4576_s28  ;;  %s4585_s30 = int_to_ptr.vmem [resolvable:$true] %s783_s30 }
  0xb3   : > { %p5556_p11 = scmp.ne.s32.totalorder (!%p3009_p2), %s5524_s11, 0 }
  0xb6   : > { %s5555_s5 = smov %s5554_s26  ;;  %s4583_s12 = scalar_lea.hbm %s5554_s26, %s3016_s4 }
  0xb7   : > { %s3503_s16 = scalar_lea.hbm %s4583_s12, 64  ;;  %s3507_s4 = scalar_lea.hbm %s5555_s5, 256 }
  0xb8   : > { %p3504_p0 = scmp.ne.s32.totalorder %s4583_s12, %s3503_s16  ;;  %p3508_p9 = scmp.lt.u32.totalorder %s4583_s12, %s5555_s5 }
  0xb9   : > { %p3509_p6 = scmp.lt.u32.totalorder %s3507_s4, %s3503_s16  ;;  %p3511_p10 = scmp.lt.u32.totalorder %s3503_s16, %s4583_s12 }
  0xba   : > { %p3505_p12 = pnand %p3504_p0, %p5556_p11 }
  0xbb   : > { %p3510_p1 = por %p3509_p6, %p3508_p9 }
  0xbc   : > { %p3506_p13 = pneg %p3505_p12 }
  0xbd   : > { %p3512_p5 = por %p3511_p10, %p3510_p1 }
  0xbf   : > { %p3513_p3 = pnand %p3512_p5, %p3506_p13 }
  0xc1   : > { %3516 = shalt.err (!%p3513_p3)
}
  0xc2   : > { %s3517_s0 = scalar_lea.vmem %s4585_s30, 64  ;;  %s4123_s22 = smov [#allocation5]  }
  0xc3   : > { %p3518_p7 = scmp.ne.s32.totalorder %s4585_s30, %s3517_s0  ;;  %s3521_s26 = sshll.u32 %s4123_s22, 4  ;;  %s3522_s26 = int_to_ptr.vmem [resolvable:$false] %s3521_s26 }
  0xc4   : > { %s3523_s21 = scalar_lea.vmem %s3522_s26, 128  ;;  %p3524_p2 = scmp.lt.s32.totalorder %s4585_s30, %s3522_s26 }
  0xc5   : > { %p3519_p8 = pnand %p3518_p7, %p5556_p11  ;;  %p3525_p0 = scmp.lt.s32.totalorder %s3523_s21, %s3517_s0 }
  0xc7   : > { %p3520_p4 = pneg %p3519_p8  ;;  %p3526_p12 = por %p3525_p0, %p3524_p2 }
  0xc9   : > { %p3527_p9 = pnand %p3526_p12, %p3520_p4 }
  0xcb   : > { %3530 = shalt.err (!%p3527_p9)
}
  0xcc   : > { %3221 = dma.hbm_to_vmem [thread:$0]  (%p5556_p11), %s4583_s12, 64, %s4585_s30, %s5464_s15  }
  0xcd   : > { %s815_s16 = sand.u32 1, %s4061_s25   ;;  %s4617_s3 = sshll.u32 %s4113_s14, 2 }
  0xce   : > { %s4614_s2 = sshll.u32 %s815_s16, 2  ;;  %s826_s4 = sadd.s32 %s4617_s3, %s5665_s13 }
  0xcf   : > { %s4621_s20 = sshll.u32 %s826_s4, 6  ;;  %s817_s1 = scalar_lea.vmem [#allocation8], %s4614_s2 }
  0xd0   : > { %s830_s0 = sshll.u32 %s817_s1, 4  ;;  %s5557_s21 = sld [smem:[#allocation76_spill]]  ;;  %s831_s0 = int_to_ptr.vmem [resolvable:$true] %s830_s0 }
  0xd1   : > { %s5466_s12 = scalar_lea.sflag [#allocation9], %s4576_s28  ;;  %p5559_p6 = scmp.ne.s32.totalorder %s5532_s19, 0 }
  0xd6   : > { %s5558_s5 = smov %s5557_s21  ;;  %s4628_s18 = scalar_lea.hbm %s5557_s21, %s4621_s20 }
  0xd7   : > { %s3531_s30 = scalar_lea.hbm %s4628_s18, 64  ;;  %s3535_s4 = scalar_lea.hbm %s5558_s5, 512 }
  0xd8   : > { %p3532_p13 = scmp.ne.s32.totalorder %s4628_s18, %s3531_s30  ;;  %p3536_p5 = scmp.lt.u32.totalorder %s4628_s18, %s5558_s5 }
  0xd9   : > { %p3537_p3 = scmp.lt.u32.totalorder %s3535_s4, %s3531_s30  ;;  %p3539_p8 = scmp.lt.u32.totalorder %s3531_s30, %s4628_s18 }
  0xda   : > { %p3533_p1 = pnand %p3532_p13, %p5559_p6 }
  0xdb   : > { %p3538_p7 = por %p3537_p3, %p3536_p5 }
  0xdc   : > { %p3534_p10 = pneg %p3533_p1 }
  0xdd   : > { %p3540_p4 = por %p3539_p8, %p3538_p7 }
  0xdf   : > { %p3541_p2 = pnand %p3540_p4, %p3534_p10 }
  0xe1   : > { %3544 = shalt.err (!%p3541_p2)
}
  0xe2   : > { %s3545_s22 = scalar_lea.vmem %s831_s0, 64  ;;  %s4124_s26 = smov [#allocation8]  }
  0xe3   : > { %p3546_p0 = scmp.ne.s32.totalorder %s831_s0, %s3545_s22  ;;  %s3549_s21 = sshll.u32 %s4124_s26, 4  ;;  %s3550_s21 = int_to_ptr.vmem [resolvable:$false] %s3549_s21 }
  0xe4   : > { %s3551_s13 = scalar_lea.vmem %s3550_s21, 128  ;;  %p3552_p13 = scmp.lt.s32.totalorder %s831_s0, %s3550_s21 }
  0xe5   : > { %p3547_p12 = pnand %p3546_p0, %p5559_p6  ;;  %p3553_p1 = scmp.lt.s32.totalorder %s3551_s13, %s3545_s22 }
  0xe7   : > { %p3548_p9 = pneg %p3547_p12  ;;  %p3554_p11 = por %p3553_p1, %p3552_p13 }
  0xe9   : > { %p3555_p3 = pnand %p3554_p11, %p3548_p9 }
  0xeb   : > { %3558 = shalt.err (!%p3555_p3)
}
  0xec   : > { %3223 = dma.hbm_to_vmem [thread:$0]  (%p5559_p6), %s4628_s18, 64, %s831_s0, %s5466_s12  }
  0xed   : > { %s5560_s6 = sld [smem:[#allocation79_spill]]  ;;  %s881_s4 = scalar_lea.vmem [#allocation11], %s4614_s2 }
  0xee   : > { %s894_s1 = sshll.u32 %s881_s4, 4  ;;  %s5467_s22 = scalar_lea.sflag [#allocation12], %s4576_s28  ;;  %s895_s1 = int_to_ptr.vmem [resolvable:$true] %s894_s1 }
  0xf3   : > { %s4654_s16 = scalar_lea.hbm %s5560_s6, %s4621_s20  ;;  %s3563_s0 = scalar_lea.hbm %s5560_s6, 512 }
  0xf4   : > { %s3559_s26 = scalar_lea.hbm %s4654_s16, 64  ;;  %p3564_p7 = scmp.lt.u32.totalorder %s4654_s16, %s5560_s6 }
  0xf5   : > { %p3560_p11 = scmp.ne.s32.totalorder %s4654_s16, %s3559_s26  ;;  %p3565_p8 = scmp.lt.u32.totalorder %s3563_s0, %s3559_s26 }
  0xf6   : > { %p3567_p2 = scmp.lt.u32.totalorder %s3559_s26, %s4654_s16 }
  0xf7   : > { %p3561_p10 = pnand %p3560_p11, %p5559_p6  ;;  %p3566_p4 = por %p3565_p8, %p3564_p7 }
  0xf9   : > { %p3562_p5 = pneg %p3561_p10  ;;  %p3568_p0 = por %p3567_p2, %p3566_p4 }
  0xfb   : > { %p3569_p12 = pnand %p3568_p0, %p3562_p5 }
  0xfd   : > { %3572 = shalt.err (!%p3569_p12)
}
  0xfe   : > { %s3573_s30 = scalar_lea.vmem %s895_s1, 64  ;;  %s4125_s4 = smov [#allocation11]  }
  0xff   : > { %p3574_p9 = scmp.ne.s32.totalorder %s895_s1, %s3573_s30  ;;  %s3577_s12 = sshll.u32 %s4125_s4, 4  ;;  %s3578_s12 = int_to_ptr.vmem [resolvable:$false] %s3577_s12 }
 0x100   : > { %s3579_s21 = scalar_lea.vmem %s3578_s12, 128  ;;  %p3580_p3 = scmp.lt.s32.totalorder %s895_s1, %s3578_s12 }
 0x101   : > { %p3575_p13 = pnand %p3574_p9, %p5559_p6  ;;  %p3581_p11 = scmp.lt.s32.totalorder %s3579_s21, %s3573_s30 }
 0x103   : > { %p3576_p1 = pneg %p3575_p13  ;;  %p3582_p10 = por %p3581_p11, %p3580_p3 }
 0x105   : > { %p3583_p7 = pnand %p3582_p10, %p3576_p1 }
 0x107   : > { %3586 = shalt.err (!%p3583_p7)
}
 0x108   : > { %3225 = dma.hbm_to_vmem [thread:$0]  (%p5559_p6), %s4654_s16, 64, %s895_s1, %s5467_s22  }
 0x109   : > { %s924_s26 = sand.u32 1, %s4049_s23   ;;  %s935_s18 = sadd.s32 %s4617_s3, %s5669_s9 }
 0x10a   : > { %s4680_s12 = sshll.u32 %s924_s26, 2  ;;  %s4682_s0 = sshll.u32 %s935_s18, 6 }
 0x10b   : > { %s5561_s8 = sld [smem:[#allocation81_spill]]  ;;  %s926_s4 = scalar_lea.vmem [#allocation14], %s4680_s12 }
 0x10c   : > { %s939_s21 = sshll.u32 %s926_s4, 4  ;;  %s847_s16 = sadd.s32 %s4617_s3, %s4423_s7  ;;  %s4693_s21 = int_to_ptr.vmem [resolvable:$true] %s939_s21 }
 0x10d   : > { %s4695_s9 = sshll.u32 %s847_s16, 6  ;;  %s5471_s1 = scalar_lea.sflag [#allocation15], %s4576_s28 }
 0x10e   : > { %p5562_p8 = scmp.ne.s32.totalorder %s5536_s24, 0 }
 0x111   : > { %s4688_s30 = scalar_lea.hbm %s5561_s8, %s4682_s0  ;;  %s3591_s15 = scalar_lea.hbm %s5561_s8, 512 }
 0x112   : > { %s3587_s26 = scalar_lea.hbm %s4688_s30, 64  ;;  %p3592_p0 = scmp.lt.u32.totalorder %s4688_s30, %s5561_s8 }
 0x113   : > { %p3588_p5 = scmp.ne.s32.totalorder %s4688_s30, %s3587_s26  ;;  %p3593_p12 = scmp.lt.u32.totalorder %s3591_s15, %s3587_s26 }
 0x114   : > { %p3595_p13 = scmp.lt.u32.totalorder %s3587_s26, %s4688_s30 }
 0x115   : > { %p3589_p4 = pnand %p3588_p5, %p5562_p8  ;;  %p3594_p9 = por %p3593_p12, %p3592_p0 }
 0x117   : > { %p3590_p2 = pneg %p3589_p4  ;;  %p3596_p1 = por %p3595_p13, %p3594_p9 }
 0x119   : > { %p3597_p3 = pnand %p3596_p1, %p3590_p2 }
 0x11b   : > { %3600 = shalt.err (!%p3597_p3)
}
 0x11c   : > { %s3601_s7 = scalar_lea.vmem %s4693_s21, 64  ;;  %s4126_s3 = smov [#allocation14]  }
 0x11d   : > { %p3602_p11 = scmp.ne.s32.totalorder %s4693_s21, %s3601_s7  ;;  %s3605_s4 = sshll.u32 %s4126_s3, 4  ;;  %s3606_s4 = int_to_ptr.vmem [resolvable:$false] %s3605_s4 }
 0x11e   : > { %s3607_s5 = scalar_lea.vmem %s3606_s4, 128  ;;  %p3608_p5 = scmp.lt.s32.totalorder %s4693_s21, %s3606_s4 }
 0x11f   : > { %p3603_p10 = pnand %p3602_p11, %p5562_p8  ;;  %p3609_p4 = scmp.lt.s32.totalorder %s3607_s5, %s3601_s7 }
 0x121   : > { %p3604_p7 = pneg %p3603_p10  ;;  %p3610_p0 = por %p3609_p4, %p3608_p5 }
 0x123   : > { %p3611_p12 = pnand %p3610_p0, %p3604_p7 }
 0x125   : > { %3614 = shalt.err (!%p3611_p12)
}
 0x126   : > { %3227 = dma.hbm_to_vmem [thread:$0]  (%p5562_p8), %s4688_s30, 64, %s4693_s21, %s5471_s1  }
 0x127   : > { %s5563_s10 = sld [smem:[#allocation83_spill]]  ;;  %s974_s18 = scalar_lea.vmem [#allocation17], %s4587_s27 }
 0x128   : > { %s984_s13 = sshll.u32 %s974_s18, 4  ;;  %s5472_s15 = scalar_lea.sflag [#allocation18], %s4576_s28  ;;  %s985_s13 = int_to_ptr.vmem [resolvable:$true] %s984_s13 }
 0x129   : > { %p5564_p9 = scmp.ne.s32.totalorder %s5524_s11, 0 }
 0x12d   : > { %s4725_s26 = scalar_lea.hbm %s5563_s10, %s4695_s9  ;;  %s3619_s21 = scalar_lea.hbm %s5563_s10, 512 }
 0x12e   : > { %s3615_s7 = scalar_lea.hbm %s4725_s26, 128  ;;  %p3620_p3 = scmp.lt.u32.totalorder %s4725_s26, %s5563_s10 }
 0x12f   : > { %p3616_p2 = scmp.ne.s32.totalorder %s4725_s26, %s3615_s7  ;;  %p3621_p11 = scmp.lt.u32.totalorder %s3619_s21, %s3615_s7 }
 0x130   : > { %p3623_p7 = scmp.lt.u32.totalorder %s3615_s7, %s4725_s26 }
 0x131   : > { %p3617_p13 = pnand %p3616_p2, %p5564_p9  ;;  %p3622_p10 = por %p3621_p11, %p3620_p3 }
 0x133   : > { %p3618_p1 = pneg %p3617_p13  ;;  %p3624_p5 = por %p3623_p7, %p3622_p10 }
 0x135   : > { %p3625_p4 = pnand %p3624_p5, %p3618_p1 }
 0x137   : > { %3628 = shalt.err (!%p3625_p4)
}
 0x138   : > { %s3629_s22 = scalar_lea.vmem %s985_s13, 128  ;;  %s4127_s16 = smov [#allocation17]  }
 0x139   : > { %p3630_p0 = scmp.ne.s32.totalorder %s985_s13, %s3629_s22  ;;  %s3633_s18 = sshll.u32 %s4127_s16, 4  ;;  %s3634_s18 = int_to_ptr.vmem [resolvable:$false] %s3633_s18 }
 0x13a   : > { %s3635_s3 = scalar_lea.vmem %s3634_s18, 256  ;;  %p3636_p13 = scmp.lt.s32.totalorder %s985_s13, %s3634_s18 }
 0x13b   : > { %p3631_p12 = pnand %p3630_p0, %p5564_p9  ;;  %p3637_p8 = scmp.lt.s32.totalorder %s3635_s3, %s3629_s22 }
 0x13d   : > { %p3632_p2 = pneg %p3631_p12  ;;  %p3638_p6 = por %p3637_p8, %p3636_p13 }
 0x13f   : > { %p3639_p3 = pnand %p3638_p6, %p3632_p2 }
 0x141   : > { %3642 = shalt.err (!%p3639_p3)
}
 0x142   : > { %s5565_s7 = sld [smem:[#allocation51_spill]]  ;;  %s5566_s4 = sld [smem:[#allocation85_spill]] }
 0x143   : > { %3229 = dma.hbm_to_vmem [thread:$0]  (%p5564_p9), %s4725_s26, 128, %s985_s13, %s5472_s15  }
 0x144   : > { %s1019_s22 = scalar_lea.vmem [#allocation20], %s4614_s2  ;;  %s5477_s1 = scalar_lea.sflag [#allocation21], %s4576_s28 }
 0x145   : > { %s1032_s18 = sshll.u32 %s1019_s22, 4  ;;  %p5568_p8 = scmp.ne.s32.totalorder %s5532_s19, 0  ;;  %s1033_s18 = int_to_ptr.vmem [resolvable:$true] %s1032_s18 }
 0x148   : > { %s5567_s5 = smov %s5566_s4  ;;  %s4752_s16 = scalar_lea.hbm %s5566_s4, %s4621_s20 }
 0x149   : > { %s3643_s6 = scalar_lea.hbm %s4752_s16, 64  ;;  %s3647_s30 = scalar_lea.hbm %s5567_s5, 512 }
 0x14a   : > { %p3644_p6 = scmp.ne.s32.totalorder %s4752_s16, %s3643_s6  ;;  %p3648_p10 = scmp.lt.u32.totalorder %s4752_s16, %s5567_s5 }
 0x14b   : > { %p3649_p7 = scmp.lt.u32.totalorder %s3647_s30, %s3643_s6  ;;  %p3651_p4 = scmp.lt.u32.totalorder %s3643_s6, %s4752_s16 }
 0x14c   : > { %p3645_p1 = pnand %p3644_p6, %p5568_p8 }
 0x14d   : > { %p3650_p5 = por %p3649_p7, %p3648_p10 }
 0x14e   : > { %p3646_p11 = pneg %p3645_p1 }
 0x14f   : > { %p3652_p0 = por %p3651_p4, %p3650_p5 }
 0x151   : > { %p3653_p12 = pnand %p3652_p0, %p3646_p11 }
 0x153   : > { %3656 = shalt.err (!%p3653_p12)
}
 0x154   : > { %s3657_s22 = scalar_lea.vmem %s1033_s18, 64  ;;  %s4128_s15 = smov [#allocation20]  }
 0x155   : > { %p3658_p2 = scmp.ne.s32.totalorder %s1033_s18, %s3657_s22  ;;  %s3661_s3 = sshll.u32 %s4128_s15, 4  ;;  %s3662_s3 = int_to_ptr.vmem [resolvable:$false] %s3661_s3 }
 0x156   : > { %s3663_s26 = scalar_lea.vmem %s3662_s3, 128  ;;  %p3664_p6 = scmp.lt.s32.totalorder %s1033_s18, %s3662_s3 }
 0x157   : > { %p3659_p13 = pnand %p3658_p2, %p5568_p8  ;;  %p3665_p1 = scmp.lt.s32.totalorder %s3663_s26, %s3657_s22 }
 0x159   : > { %p3660_p3 = pneg %p3659_p13  ;;  %p3666_p9 = por %p3665_p1, %p3664_p6 }
 0x15b   : > { %p3667_p7 = pnand %p3666_p9, %p3660_p3 }
 0x15d   : > { %3670 = shalt.err (!%p3667_p7)
}
 0x15e   : > { %s5569_s6 = sld [smem:[#allocation46_spill]]  ;;  %s5570_s13 = sld [smem:[#allocation58_spill]] }
 0x15f   : > { %3231 = dma.hbm_to_vmem [thread:$0]  (%p5568_p8), %s4752_s16, 64, %s1033_s18, %s5477_s1  }
 0x160   : > { %s5571_s15 = sand.u32 1, %s5565_s7   ;;  %s4035_s21 = sshll.u32 %s4113_s14, 7 }
 0x161   : > { %s3010_s30 = sshll.u32 %s5571_s15, 2  ;;  %s5572_s22 = sld [smem:[#allocation73_spill]] }
 0x162   : > { %s751_s8 = scalar_lea.vmem [#allocation2], %s3010_s30  ;;  %s5574_s25 = smov %s5571_s15 }
 0x163   : > { %s763_s10 = sshll.u32 %s751_s8, 4  ;;  %s748_s16 = scalar_lea.sflag [#allocation3], %s5574_s25  ;;  %s4786_s10 = int_to_ptr.vmem [resolvable:$true] %s763_s10 }
 0x164   : > { %s792_s29 = sand.u32 1, %s5569_s6   ;;  %p5575_p11 = scmp.ne.s32.totalorder %s5570_s13, 0 }
 0x167   : > { %s5573_s5 = smov %s5572_s22  ;;  %s4784_s26 = scalar_lea.hbm %s5572_s22, %s4035_s21 }
 0x168   : > { %s3671_s18 = scalar_lea.hbm %s4784_s26, 64  ;;  %s3675_s4 = scalar_lea.hbm %s5573_s5, 256 }
 0x169   : > { %p3672_p9 = scmp.ne.s32.totalorder %s4784_s26, %s3671_s18  ;;  %p3676_p4 = scmp.lt.u32.totalorder %s4784_s26, %s5573_s5 }
 0x16a   : > { %p3677_p0 = scmp.lt.u32.totalorder %s3675_s4, %s3671_s18  ;;  %p3679_p2 = scmp.lt.u32.totalorder %s3671_s18, %s4784_s26 }
 0x16b   : > { %p3673_p10 = pnand %p3672_p9, %p5575_p11 }
 0x16c   : > { %p3678_p12 = por %p3677_p0, %p3676_p4 }
 0x16d   : > { %p3674_p5 = pneg %p3673_p10 }
 0x16e   : > { %p3680_p13 = por %p3679_p2, %p3678_p12 }
 0x170   : > { %p3681_p3 = pnand %p3680_p13, %p3674_p5 }
 0x172   : > { %3684 = shalt.err (!%p3681_p3)
}
 0x173   : > { %s3685_s8 = scalar_lea.vmem %s4786_s10, 64  ;;  %s4129_s25 = smov [#allocation2]  }
 0x174   : > { %p3686_p6 = scmp.ne.s32.totalorder %s4786_s10, %s3685_s8  ;;  %s3689_s7 = sshll.u32 %s4129_s25, 4  ;;  %s3690_s7 = int_to_ptr.vmem [resolvable:$false] %s3689_s7 }
 0x175   : > { %s3691_s1 = scalar_lea.vmem %s3690_s7, 128  ;;  %p3692_p9 = scmp.lt.s32.totalorder %s4786_s10, %s3690_s7 }
 0x176   : > { %p3687_p1 = pnand %p3686_p6, %p5575_p11  ;;  %p3693_p10 = scmp.lt.s32.totalorder %s3691_s1, %s3685_s8 }
 0x178   : > { %p3688_p7 = pneg %p3687_p1  ;;  %p3694_p4 = por %p3693_p10, %p3692_p9 }
 0x17a   : > { %p3695_p0 = pnand %p3694_p4, %p3688_p7 }
 0x17c   : > { %3698 = shalt.err (!%p3695_p0)
}
 0x17d   : > { %s5576_s30 = sld [smem:[#allocation63_spill]]  ;;  %s3017_s18 = sshll.u32 %s792_s29, 2 }
 0x17e   : > { %3220 = dma.hbm_to_vmem [thread:$0]  (%p5575_p11), %s4784_s26, 64, %s4786_s10, %s748_s16  }
 0x17f   : > { %s4037_s15 = sadd.s32 64, %s4035_s21  ;;  %s5577_s22 = sld [smem:[#allocation75_spill]] }
 0x180   : > { %s794_s13 = scalar_lea.vmem [#allocation7], %s3017_s18 }
 0x181   : > { %s806_s8 = sshll.u32 %s794_s13, 4  ;;  %s807_s8 = int_to_ptr.vmem [resolvable:$true] %s806_s8 }
 0x183   : > { %p5579_p12 = scmp.ne.s32.totalorder %s5576_s30, 0 }
 0x185   : > { %s5578_s5 = smov %s5577_s22  ;;  %s4819_s25 = scalar_lea.hbm %s5577_s22, %s4037_s15 }
 0x186   : > { %s3699_s7 = scalar_lea.hbm %s4819_s25, 64  ;;  %s3703_s6 = scalar_lea.hbm %s5578_s5, 256 }
 0x187   : > { %p3700_p5 = scmp.ne.s32.totalorder %s4819_s25, %s3699_s7  ;;  %p3704_p13 = scmp.lt.u32.totalorder %s4819_s25, %s5578_s5 }
 0x188   : > { %p3705_p3 = scmp.lt.u32.totalorder %s3703_s6, %s3699_s7  ;;  %p3707_p1 = scmp.lt.u32.totalorder %s3699_s7, %s4819_s25 }
 0x189   : > { %p3701_p11 = pnand %p3700_p5, %p5579_p12 }
 0x18a   : > { %p3706_p6 = por %p3705_p3, %p3704_p13 }
 0x18b   : > { %p3702_p2 = pneg %p3701_p11 }
 0x18c   : > { %p3708_p7 = por %p3707_p1, %p3706_p6 }
 0x18e   : > { %p3709_p9 = pnand %p3708_p7, %p3702_p2 }
 0x190   : > { %3712 = shalt.err (!%p3709_p9)
}
 0x191   : > { %s3713_s16 = scalar_lea.vmem %s807_s8, 64  ;;  %s4130_s1 = smov [#allocation7]  }
 0x192   : > { %p3714_p10 = scmp.ne.s32.totalorder %s807_s8, %s3713_s16  ;;  %s3717_s18 = sshll.u32 %s4130_s1, 4  ;;  %s3718_s18 = int_to_ptr.vmem [resolvable:$false] %s3717_s18 }
 0x193   : > { %s3719_s15 = scalar_lea.vmem %s3718_s18, 128  ;;  %p3720_p5 = scmp.lt.s32.totalorder %s807_s8, %s3718_s18 }
 0x194   : > { %p3715_p4 = pnand %p3714_p10, %p5579_p12  ;;  %p3721_p11 = scmp.lt.s32.totalorder %s3719_s15, %s3713_s16 }
 0x196   : > { %p3716_p0 = pneg %p3715_p4  ;;  %p3722_p8 = por %p3721_p11, %p3720_p5 }
 0x198   : > { %p3723_p3 = pnand %p3722_p8, %p3716_p0 }
 0x19a   : > { %3726 = shalt.err (!%p3723_p3)
}
 0x19b   : > { %s5580_s3 = scalar_lea.sflag [#allocation6], %s4576_s28  ;;  %s5581_s13 = sld [smem:[#allocation77_spill]] }
 0x19c   : > { %3222 = dma.hbm_to_vmem [thread:$0]  (%p5579_p12), %s4819_s25, 64, %s807_s8, %s5580_s3  }
 0x19d   : > { %s841_s10 = scalar_lea.vmem [#allocation10], %s4587_s27  ;;  %p5582_p2 = scmp.ne.s32.totalorder %s5524_s11, 0 }
 0x19e   : > { %s851_s29 = sshll.u32 %s841_s10, 4  ;;  %s852_s29 = int_to_ptr.vmem [resolvable:$true] %s851_s29 }
 0x1a1   : > { %s4844_s7 = scalar_lea.hbm %s5581_s13, %s4695_s9  ;;  %s3731_s25 = scalar_lea.hbm %s5581_s13, 512 }
 0x1a2   : > { %s3727_s30 = scalar_lea.hbm %s4844_s7, 128  ;;  %p3732_p12 = scmp.lt.u32.totalorder %s4844_s7, %s5581_s13 }
 0x1a3   : > { %p3728_p8 = scmp.ne.s32.totalorder %s4844_s7, %s3727_s30  ;;  %p3733_p1 = scmp.lt.u32.totalorder %s3731_s25, %s3727_s30 }
 0x1a4   : > { %p3735_p9 = scmp.lt.u32.totalorder %s3727_s30, %s4844_s7 }
 0x1a5   : > { %p3729_p13 = pnand %p3728_p8, %p5582_p2  ;;  %p3734_p7 = por %p3733_p1, %p3732_p12 }
 0x1a7   : > { %p3730_p6 = pneg %p3729_p13  ;;  %p3736_p10 = por %p3735_p9, %p3734_p7 }
 0x1a9   : > { %p3737_p4 = pnand %p3736_p10, %p3730_p6 }
 0x1ab   : > { %3740 = shalt.err (!%p3737_p4)
}
 0x1ac   : > { %s3741_s16 = scalar_lea.vmem %s852_s29, 128  ;;  %s4131_s1 = smov [#allocation10]  }
 0x1ad   : > { %p3742_p0 = scmp.ne.s32.totalorder %s852_s29, %s3741_s16  ;;  %s3745_s18 = sshll.u32 %s4131_s1, 4  ;;  %s3746_s18 = int_to_ptr.vmem [resolvable:$false] %s3745_s18 }
 0x1ae   : > { %s3747_s15 = scalar_lea.vmem %s3746_s18, 256  ;;  %p3748_p3 = scmp.lt.s32.totalorder %s852_s29, %s3746_s18 }
 0x1af   : > { %p3743_p5 = pnand %p3742_p0, %p5582_p2  ;;  %p3749_p8 = scmp.lt.s32.totalorder %s3747_s15, %s3741_s16 }
 0x1b1   : > { %p3744_p11 = pneg %p3743_p5  ;;  %p3750_p13 = por %p3749_p8, %p3748_p3 }
 0x1b3   : > { %p3751_p1 = pnand %p3750_p13, %p3744_p11 }
 0x1b5   : > { %3754 = shalt.err (!%p3751_p1)
}
 0x1b6   : > { %s5583_s3 = scalar_lea.sflag [#allocation9], %s4576_s28  ;;  %s5584_s10 = sld [smem:[#allocation80_spill]] }
 0x1b7   : > { %3224 = dma.hbm_to_vmem [thread:$0]  (%p5582_p2), %s4844_s7, 128, %s852_s29, %s5583_s3  }
 0x1b8   : > { %s905_s6 = scalar_lea.vmem [#allocation13], %s4587_s27 }
 0x1b9   : > { %s915_s21 = sshll.u32 %s905_s6, 4  ;;  %s916_s21 = int_to_ptr.vmem [resolvable:$true] %s915_s21 }
 0x1bc   : > { %s4870_s30 = scalar_lea.hbm %s5584_s10, %s4695_s9  ;;  %s3759_s7 = scalar_lea.hbm %s5584_s10, 512 }
 0x1bd   : > { %s3755_s25 = scalar_lea.hbm %s4870_s30, 128  ;;  %p3760_p9 = scmp.lt.u32.totalorder %s4870_s30, %s5584_s10 }
 0x1be   : > { %p3756_p6 = scmp.ne.s32.totalorder %s4870_s30, %s3755_s25  ;;  %p3761_p10 = scmp.lt.u32.totalorder %s3759_s7, %s3755_s25 }
 0x1bf   : > { %p3763_p0 = scmp.lt.u32.totalorder %s3755_s25, %s4870_s30 }
 0x1c0   : > { %p3757_p12 = pnand %p3756_p6, %p5582_p2  ;;  %p3762_p4 = por %p3761_p10, %p3760_p9 }
 0x1c2   : > { %p3758_p7 = pneg %p3757_p12  ;;  %p3764_p5 = por %p3763_p0, %p3762_p4 }
 0x1c4   : > { %p3765_p11 = pnand %p3764_p5, %p3758_p7 }
 0x1c6   : > { %3768 = shalt.err (!%p3765_p11)
}
 0x1c7   : > { %s3769_s1 = scalar_lea.vmem %s916_s21, 128  ;;  %s4132_s18 = smov [#allocation13]  }
 0x1c8   : > { %p3770_p3 = scmp.ne.s32.totalorder %s916_s21, %s3769_s1  ;;  %s3773_s15 = sshll.u32 %s4132_s18, 4  ;;  %s3774_s15 = int_to_ptr.vmem [resolvable:$false] %s3773_s15 }
 0x1c9   : > { %s3775_s3 = scalar_lea.vmem %s3774_s15, 256  ;;  %p3776_p1 = scmp.lt.s32.totalorder %s916_s21, %s3774_s15 }
 0x1ca   : > { %p3771_p8 = pnand %p3770_p3, %p5582_p2  ;;  %p3777_p6 = scmp.lt.s32.totalorder %s3775_s3, %s3769_s1 }
 0x1cc   : > { %p3772_p13 = pneg %p3771_p8  ;;  %p3778_p12 = por %p3777_p6, %p3776_p1 }
 0x1ce   : > { %p3779_p9 = pnand %p3778_p12, %p3772_p13 }
 0x1d0   : > { %3782 = shalt.err (!%p3779_p9)
}
 0x1d1   : > { %s5585_s4 = scalar_lea.sflag [#allocation12], %s4576_s28  ;;  %s5586_s25 = sld [smem:[#allocation82_spill]] }
 0x1d2   : > { %3226 = dma.hbm_to_vmem [thread:$0]  (%p5582_p2), %s4870_s30, 128, %s916_s21, %s5585_s4  }
 0x1d3   : > { %s950_s7 = scalar_lea.vmem [#allocation16], %s4614_s2  ;;  %p5588_p10 = scmp.ne.s32.totalorder %s5532_s19, 0 }
 0x1d4   : > { %s963_s29 = sshll.u32 %s950_s7, 4  ;;  %s964_s29 = int_to_ptr.vmem [resolvable:$true] %s963_s29 }
 0x1d7   : > { %s5587_s8 = smov %s5586_s25  ;;  %s4896_s26 = scalar_lea.hbm %s5586_s25, %s4621_s20 }
 0x1d8   : > { %s3783_s16 = scalar_lea.hbm %s4896_s26, 64  ;;  %s3787_s30 = scalar_lea.hbm %s5587_s8, 512 }
 0x1d9   : > { %p3784_p7 = scmp.ne.s32.totalorder %s4896_s26, %s3783_s16  ;;  %p3788_p5 = scmp.lt.u32.totalorder %s4896_s26, %s5587_s8 }
 0x1da   : > { %p3789_p11 = scmp.lt.u32.totalorder %s3787_s30, %s3783_s16  ;;  %p3791_p8 = scmp.lt.u32.totalorder %s3783_s16, %s4896_s26 }
 0x1db   : > { %p3785_p4 = pnand %p3784_p7, %p5588_p10 }
 0x1dc   : > { %p3790_p3 = por %p3789_p11, %p3788_p5 }
 0x1dd   : > { %p3786_p0 = pneg %p3785_p4 }
 0x1de   : > { %p3792_p13 = por %p3791_p8, %p3790_p3 }
 0x1e0   : > { %p3793_p1 = pnand %p3792_p13, %p3786_p0 }
 0x1e2   : > { %3796 = shalt.err (!%p3793_p1)
}
 0x1e3   : > { %s3797_s2 = scalar_lea.vmem %s964_s29, 64  ;;  %s4133_s20 = smov [#allocation16]  }
 0x1e4   : > { %p3798_p6 = scmp.ne.s32.totalorder %s964_s29, %s3797_s2  ;;  %s3801_s3 = sshll.u32 %s4133_s20, 4  ;;  %s3802_s3 = int_to_ptr.vmem [resolvable:$false] %s3801_s3 }
 0x1e5   : > { %s3803_s4 = scalar_lea.vmem %s3802_s3, 128  ;;  %p3804_p7 = scmp.lt.s32.totalorder %s964_s29, %s3802_s3 }
 0x1e6   : > { %p3799_p12 = pnand %p3798_p6, %p5588_p10  ;;  %p3805_p4 = scmp.lt.s32.totalorder %s3803_s4, %s3797_s2 }
 0x1e8   : > { %p3800_p9 = pneg %p3799_p12  ;;  %p3806_p2 = por %p3805_p4, %p3804_p7 }
 0x1ea   : > { %p3807_p5 = pnand %p3806_p2, %p3800_p9 }
 0x1ec   : > { %3810 = shalt.err (!%p3807_p5)
}
 0x1ed   : > { %s5589_s22 = scalar_lea.sflag [#allocation15], %s4576_s28  ;;  %s5590_s7 = sld [smem:[#allocation84_spill]] }
 0x1ee   : > { %3228 = dma.hbm_to_vmem [thread:$0]  (%p5588_p10), %s4896_s26, 64, %s964_s29, %s5589_s22  }
 0x1ef   : > { %s995_s1 = scalar_lea.vmem [#allocation19], %s4680_s12  ;;  %p5591_p0 = scmp.ne.s32.totalorder %s5536_s24, 0 }
 0x1f0   : > { %s1008_s18 = sshll.u32 %s995_s1, 4  ;;  %s1009_s18 = int_to_ptr.vmem [resolvable:$true] %s1008_s18 }
 0x1f3   : > { %s4922_s16 = scalar_lea.hbm %s5590_s7, %s4682_s0  ;;  %s3815_s26 = scalar_lea.hbm %s5590_s7, 512 }
 0x1f4   : > { %s3811_s19 = scalar_lea.hbm %s4922_s16, 64  ;;  %p3816_p10 = scmp.lt.u32.totalorder %s4922_s16, %s5590_s7 }
 0x1f5   : > { %p3812_p2 = scmp.ne.s32.totalorder %s4922_s16, %s3811_s19  ;;  %p3817_p8 = scmp.lt.u32.totalorder %s3815_s26, %s3811_s19 }
 0x1f6   : > { %p3819_p1 = scmp.lt.u32.totalorder %s3811_s19, %s4922_s16 }
 0x1f7   : > { %p3813_p11 = pnand %p3812_p2, %p5591_p0  ;;  %p3818_p13 = por %p3817_p8, %p3816_p10 }
 0x1f9   : > { %p3814_p3 = pneg %p3813_p11  ;;  %p3820_p6 = por %p3819_p1, %p3818_p13 }
 0x1fb   : > { %p3821_p12 = pnand %p3820_p6, %p3814_p3 }
 0x1fd   : > { %3824 = shalt.err (!%p3821_p12)
}
 0x1fe   : > { %s3825_s12 = scalar_lea.vmem %s1009_s18, 64  ;;  %s4134_s0 = smov [#allocation19]  }
 0x1ff   : > { %p3826_p9 = scmp.ne.s32.totalorder %s1009_s18, %s3825_s12  ;;  %s3829_s2 = sshll.u32 %s4134_s0, 4  ;;  %s3830_s2 = int_to_ptr.vmem [resolvable:$false] %s3829_s2 }
 0x200   : > { %s3831_s20 = scalar_lea.vmem %s3830_s2, 128  ;;  %p3832_p5 = scmp.lt.s32.totalorder %s1009_s18, %s3830_s2 }
 0x201   : > { %p3827_p7 = pnand %p3826_p9, %p5591_p0  ;;  %p3833_p2 = scmp.lt.s32.totalorder %s3831_s20, %s3825_s12 }
 0x203   : > { %p3828_p4 = pneg %p3827_p7  ;;  %p3834_p11 = por %p3833_p2, %p3832_p5 }
 0x205   : > { %p3835_p8 = pnand %p3834_p11, %p3828_p4 }
 0x207   : > { %3838 = shalt.err (!%p3835_p8)
}
 0x208   : > { %s5592_s3 = scalar_lea.sflag [#allocation18], %s4576_s28  ;;  %s5593_s6 = sld [smem:[#allocation86_spill]] }
 0x209   : > { %3230 = dma.hbm_to_vmem [thread:$0]  (%p5591_p0), %s4922_s16, 64, %s1009_s18, %s5592_s3  }
 0x20a   : > { %s1043_s1 = scalar_lea.vmem [#allocation22], %s4587_s27  ;;  %p5594_p10 = scmp.ne.s32.totalorder %s5524_s11, 0 }
 0x20b   : > { %s1053_s19 = sshll.u32 %s1043_s1, 4  ;;  %s1054_s19 = int_to_ptr.vmem [resolvable:$true] %s1053_s19 }
 0x20e   : > { %s4948_s25 = scalar_lea.hbm %s5593_s6, %s4695_s9  ;;  %s3843_s16 = scalar_lea.hbm %s5593_s6, 512 }
 0x20f   : > { %s3839_s24 = scalar_lea.hbm %s4948_s25, 128  ;;  %p3844_p0 = scmp.lt.u32.totalorder %s4948_s25, %s5593_s6 }
 0x210   : > { %p3840_p3 = scmp.ne.s32.totalorder %s4948_s25, %s3839_s24  ;;  %p3845_p6 = scmp.lt.u32.totalorder %s3843_s16, %s3839_s24 }
 0x211   : > { %p3847_p9 = scmp.lt.u32.totalorder %s3839_s24, %s4948_s25 }
 0x212   : > { %p3841_p13 = pnand %p3840_p3, %p5594_p10  ;;  %p3846_p12 = por %p3845_p6, %p3844_p0 }
 0x214   : > { %p3842_p1 = pneg %p3841_p13  ;;  %p3848_p7 = por %p3847_p9, %p3846_p12 }
 0x216   : > { %p3849_p4 = pnand %p3848_p7, %p3842_p1 }
 0x218   : > { %3852 = shalt.err (!%p3849_p4)
}
 0x219   : > { %s3853_s27 = scalar_lea.vmem %s1054_s19, 128  ;;  %s4135_s9 = smov [#allocation22]  }
 0x21a   : > { %p3854_p5 = scmp.ne.s32.totalorder %s1054_s19, %s3853_s27  ;;  %s3857_s29 = sshll.u32 %s4135_s9, 4  ;;  %s3858_s29 = int_to_ptr.vmem [resolvable:$false] %s3857_s29 }
 0x21b   : > { %s3859_s15 = scalar_lea.vmem %s3858_s29, 256  ;;  %p3860_p8 = scmp.lt.s32.totalorder %s1054_s19, %s3858_s29 }
 0x21c   : > { %p3855_p2 = pnand %p3854_p5, %p5594_p10  ;;  %p3861_p3 = scmp.lt.s32.totalorder %s3859_s15, %s3853_s27 }
 0x21e   : > { %p3856_p11 = pneg %p3855_p2  ;;  %p3862_p13 = por %p3861_p3, %p3860_p8 }
 0x220   : > { %p3863_p0 = pnand %p3862_p13, %p3856_p11 }
 0x222   : > { %3866 = shalt.err (!%p3863_p0)
}
 0x223   : > { %s5595_s12 = scalar_lea.sflag [#allocation21], %s4576_s28 }
 0x224   : > { %3232 = dma.hbm_to_vmem [thread:$0]  (%p5594_p10), %s4948_s25, 128, %s1054_s19, %s5595_s12  }
 0x225 PF: > { %s5596_s0 = sld [smem:[#allocation72_spill]] }
 0x22b   : > { %p5597_p1 = scmp.ne.s32.totalorder %s5596_s0, 0 }
 0x22c   : > { %s5598_s2 = sld [smem:[#allocation50_spill]] (!%p5597_p1)  ;;  %s5599_s20 = sld [smem:[#allocation60_spill]] (!%p5597_p1) }
 0x22d   : > { %1081 = sbr.rel (%p5597_p1) target bundleno = 1691 (0x69b), region = 100 }
 0x232   : > { %s1083_s3 = sand.u32 (!%p5597_p1), 1, %s5598_s2   ;;  %p5600_p6 = scmp.ne.s32.totalorder (!%p5597_p1), %s5599_s20, 0 }
 0x233   : > { %s4973_s4 = sshll.u32 (!%p5597_p1), %s1083_s3, 2  ;;  %s1084_s22 = scalar_lea.sflag (!%p5597_p1), [#allocation3], %s1083_s3 }
 0x234   : > { %s1087_s1 = scalar_lea.vmem [#allocation2], %s4973_s4 }
 0x235   : > { %3976 = dma.done.wait (%p5600_p6), %s1084_s22, 64  }
 0x236   : > { %3978 = vsyncadd (%p5600_p6), %s1084_s22, 4294967232  ;;  %s5601_s11 = sld [smem:[#allocation55_spill]]  ;;  %s5602_s28 = sld [smem:[#allocation48_spill]] }
 0x237   : > { %s5603_s25 = sld [smem:[#allocation62_spill]] }
 0x23c   : > { %s4981_s19 = sand.u32 1, %s5601_s11   ;;  %s4984_s24 = sand.u32 1, %s5602_s28  }
 0x23d   : > { %s3066_s30 = sshll.u32 %s4984_s24, 2  ;;  %s1093_s21 = scalar_lea.sflag [#allocation6], %s4981_s19 }
 0x23e   : > { %s4988_s16 = scalar_lea.vmem [#allocation5], %s3066_s30  ;;  %p5604_p10 = scmp.ne.s32.totalorder %s5603_s25, 0 }
 0x240   : > { %3980 = dma.done.wait (%p5604_p10), %s1093_s21, 64  }
 0x241   : > { %3982 = vsyncadd (%p5604_p10), %s1093_s21, 4294967232  ;;  %s5605_s18 = sld [smem:[#allocation45_spill]]  ;;  %s5606_s26 = sld [smem:[#allocation64_spill]] }
 0x247   : > { %s1103_s27 = sand.u32 1, %s5605_s18   ;;  %p5607_p12 = scmp.ne.s32.totalorder %s5606_s26, 0 }
 0x248   : > { %s4995_s9 = sshll.u32 %s1103_s27, 2 }
 0x249   : > { %s1105_s29 = scalar_lea.vmem [#allocation7], %s4995_s9 }
 0x24a   : > { %3984 = dma.done.wait (%p5607_p12), %s1093_s21, 64  }
 0x24b   : > { %3986 = vsyncadd (%p5607_p12), %s1093_s21, 4294967232  ;;  %s5608_s15 = sld [smem:[#allocation43_spill]]  ;;  %s5609_s12 = sld [smem:[#allocation66_spill]] }
 0x24c   : > { %s1111_s20 = scalar_lea.sflag [#allocation9], %s4981_s19 }
 0x251   : > { %s1112_s0 = sand.u32 1, %s5608_s15   ;;  %p5610_p9 = scmp.ne.s32.totalorder %s5609_s12, 0 }
 0x252   : > { %s5003_s2 = sshll.u32 %s1112_s0, 2 }
 0x253   : > { %s1114_s3 = scalar_lea.vmem [#allocation8], %s5003_s2 }
 0x254   : > { %3988 = dma.done.wait (%p5610_p9), %s1111_s20, 64  }
 0x255   : > { %3990 = vsyncadd (%p5610_p9), %s1111_s20, 4294967232  ;;  %s5012_s22 = sshll.u32 %s4984_s24, 3 }
 0x256   : > { %s1123_s28 = scalar_lea.vmem [#allocation10], %s5012_s22 }
 0x257   : > { %3992 = dma.done.wait (%p5604_p10), %s1111_s20, 128  }
 0x258   : > { %3994 = vsyncadd (%p5604_p10), %s1111_s20, 4294967168  ;;  %s1129_s30 = scalar_lea.sflag [#allocation12], %s4981_s19 }
 0x259   : > { %3996 = dma.done.wait (%p5610_p9), %s1129_s30, 64  }
 0x25a   : > { %3998 = vsyncadd (%p5610_p9), %s1129_s30, 4294967232 }
 0x25b   : > { %4000 = dma.done.wait (%p5604_p10), %s1129_s30, 128  }
 0x25c   : > { %4002 = vsyncadd (%p5604_p10), %s1129_s30, 4294967168  ;;  %s5611_s26 = sld [smem:[#allocation42_spill]]  ;;  %s5612_s27 = sld [smem:[#allocation68_spill]] }
 0x25d   : > { %s1147_s20 = scalar_lea.sflag [#allocation15], %s4981_s19 }
 0x262   : > { %s1148_s15 = sand.u32 1, %s5611_s26   ;;  %p5613_p7 = scmp.ne.s32.totalorder %s5612_s27, 0 }
 0x263   : > { %s5031_s0 = sshll.u32 %s1148_s15, 2 }
 0x264   : > { %s1150_s21 = scalar_lea.vmem [#allocation14], %s5031_s0 }
 0x265   : > { %4004 = dma.done.wait (%p5613_p7), %s1147_s20, 64  }
 0x266   : > { %4006 = vsyncadd (%p5613_p7), %s1147_s20, 4294967232 }
 0x267   : > { %4008 = dma.done.wait (%p5610_p9), %s1147_s20, 64  }
 0x268   : > { %4010 = vsyncadd (%p5610_p9), %s1147_s20, 4294967232  ;;  %s1165_s30 = scalar_lea.sflag [#allocation18], %s4981_s19 }
 0x269   : > { %4012 = dma.done.wait (%p5604_p10), %s1165_s30, 128  }
 0x26a   : > { %4014 = vsyncadd (%p5604_p10), %s1165_s30, 4294967168  ;;  %s1177_s15 = scalar_lea.vmem [#allocation19], %s5031_s0 }
 0x26b   : > { %4016 = dma.done.wait (%p5613_p7), %s1165_s30, 64  }
 0x26c   : > { %4018 = vsyncadd (%p5613_p7), %s1165_s30, 4294967232  ;;  %s1183_s20 = scalar_lea.sflag [#allocation21], %s4981_s19  ;;  %s1186_s18 = scalar_lea.vmem [#allocation20], %s5003_s2 }
 0x26d   : > { %4020 = dma.done.wait (%p5610_p9), %s1183_s20, 64  }
 0x26e   : > { %4022 = vsyncadd (%p5610_p9), %s1183_s20, 4294967232  ;;  %s1195_s26 = scalar_lea.vmem [#allocation22], %s5012_s22 }
 0x26f   : > { %4024 = dma.done.wait (%p5604_p10), %s1183_s20, 128  }
 0x270   : > { %4026 = vsyncadd (%p5604_p10), %s1183_s20, 4294967168  ;;  %p5614_p4 = scmp.eq.s32.totalorder %s5601_s11, 0 }
 0x272   : > { %4028 = dma.done.wait (%p5614_p4), [#allocation24], 6592   ;;  %p5615_p5 = pmov %p5614_p4 }
 0x273   : > { %s5616_s19 = sld [smem:[#allocation52_spill]]  ;;  %s5617_s27 = sld [smem:[#allocation53_spill]]  ;;  %v4136_v0 = vmov 0.0|0.0   ;;  %v1413_v1 = vld [vmem:[%s4988_s16] sm:$0xf]  ;;  %v1431_v4 = vld [vmem:[#allocation23 + $0x8] sm:$0xff]  ;;  %v1638_v23 = vlaneseq }
 0x274   : > { %4030 = vsyncadd (%p5615_p5), [#allocation24], 4294960704  ;;  %3184 = vmatprep.subr.bf16.mxu1 %v4136_v0  ;;  %v1412_v2 = vld [vmem:[%s1087_s1] sm:$0xf]  ;;  %v1414_v3 = vld [vmem:[%s1105_s29] sm:$0xf] }
 0x275   : > { %s4137_s11 = smov 2   ;;  %v1434_v5 = vld [vmem:[#allocation23 + $0x20] sm:$0xff]  ;;  %v1433_v8 = vld [vmem:[#allocation23 + $0x18] sm:$0xff]  ;;  %v1432_v9 = vld [vmem:[#allocation23 + $0x10] sm:$0xff]  ;;  %v5104_v33 = vand.u32 127, %v1638_v23  ;;  %vm1485_vm1 = vcmask 1043456  }
 0x276   : > { %1420 = vrot.lane.b32.xlu0 %v1413_v1, %s4137_s11  ;;  %1416 = vrot.lane.b32.xlu1 %v1412_v2, %s4137_s11  ;;  %v1430_v6 = vld [vmem:[#allocation23] sm:$0xff]  ;;  %v3152_v7 = vpack.c.bf16 %v1434_v5, %v1431_v4  ;;  %v1435_v10 = vld [vmem:[#allocation23 + $0x28] sm:$0xff]  ;;  %v1437_v13 = vld [vmem:[#allocation23 + $0x38] sm:$0xff]  ;;  %vm1427_vm2 = vcmask 15360   ;;  %vm1481_vm3 = vcmask 31744   ;;  %vm1725_vm8 = vcmask 1031168  }
 0x277   : > { %v3154_v11 = vpack.c.bf16 %v1433_v8, %v1430_v6  ;;  %v3185_v12 = vpack.c.bf16 %v1435_v10, %v1432_v9  ;;  %v1440_v14 = vld [vmem:[#allocation23 + $0x50] sm:$0xff]  ;;  %v1439_v17 = vld [vmem:[#allocation23 + $0x48] sm:$0xff]  ;;  %v1438_v18 = vld [vmem:[#allocation23 + $0x40] sm:$0xff]  ;;  %vm2034_vm9 = vcmask 1014784   ;;  %vm4144_vm10 = vmmov 0  }
 0x278   : > { %v1436_v15 = vld [vmem:[#allocation23 + $0x30] sm:$0xff]  ;;  %3153 = vmatprep.subr.bf16.mxu0 %v3152_v7  ;;  %v3156_v16 = vpack.c.bf16 %v1440_v14, %v1437_v13  ;;  %v1441_v19 = vld [vmem:[#allocation23 + $0x58] sm:$0xff]  ;;  %v1443_v21 = vld [vmem:[#allocation23 + $0x68] sm:$0xff] }
 0x279   : > { %s3081_s12 = sshll.u32 %s5616_s19, 1  ;;  %p1359_p11 = scmp.lt.s32.totalorder %s5617_s27, 1  ;;  %3155 = vmatpush1.bf16.msra.mxu0 %v3154_v11  ;;  %v3158_v20 = vpack.c.bf16 %v1439_v17, %v1436_v15  ;;  %v1446_v22 = vld [vmem:[#allocation23 + $0x80] sm:$0xff]  ;;  %3186 = vmatpush1.bf16.msra.mxu1 %v3185_v12  ;;  %v3188_v24 = vpack.c.bf16 %v1441_v19, %v1438_v18  ;;  %v1445_v27 = vld [vmem:[#allocation23 + $0x78] sm:$0xff]  ;;  %v1444_v28 = vld [vmem:[#allocation23 + $0x70] sm:$0xff] }
 0x27a   : > { %s5074_s30 = sadd.s32 2, %s3081_s12  ;;  %s5094_s1 = sshll.u32 %s5616_s19, 8  ;;  %1424 = vrot.lane.b32.xlu0 %v1414_v3, %s4137_s11  ;;  %3157 = vmatprep.subr.bf16.mxu0 %v3156_v16  ;;  %v3160_v25 = vpack.c.bf16 %v1446_v22, %v1443_v21  ;;  %v1442_v26 = vld [vmem:[#allocation23 + $0x60] sm:$0xff]  ;;  %v1447_v29 = vld [vmem:[#allocation23 + $0x88] sm:$0xff]  ;;  %v1449_v30 = vld [vmem:[#allocation23 + $0x98] sm:$0xff] }
 0x27b   : > { %p1357_p2 = scmp.lt.s32.totalorder %s5074_s30, 3  ;;  %3187 = vmatprep.subr.bf16.mxu1 %v4136_v0  ;;  %v1452_v31 = vld [vmem:[#allocation23 + $0xb0] sm:$0xff]  ;;  %s1643_s9 = sadd.s32 256, %s5094_s1  ;;  %v3162_v32 = vpack.c.bf16 %v1445_v27, %v1442_v26  ;;  %v3191_v34 = vpack.c.bf16 %v1447_v29, %v1444_v28  ;;  %v1451_v37 = vld [vmem:[#allocation23 + $0xa8] sm:$0xff]  ;;  %v1450_v38 = vld [vmem:[#allocation23 + $0xa0] sm:$0xff]  ;;  %v4139_v29 = vmov 0.0  }
 0x27c   : > { %s5091_s4 = scalar_select %p1359_p11, %s5617_s27, 1  ;;  %v3164_v35 = vpack.c.bf16 %v1452_v31, %v1449_v30  ;;  %v1448_v36 = vld [vmem:[#allocation23 + $0x90] sm:$0xff]  ;;  %v1644_v39 = vstv %s1643_s9  ;;  %v1453_v40 = vld [vmem:[#allocation23 + $0xb8] sm:$0xff]  ;;  %v1455_v41 = vld [vmem:[#allocation23 + $0xc8] sm:$0xff] }
 0x27d   : > { %s1358_s25 = scalar_select %p1357_p2, %s5074_s30, 3  ;;  %3159 = vmatpush1.bf16.msra.mxu0 %v3158_v20  ;;  %3189 = vmatpush1.bf16.msra.mxu1 %v3188_v24  ;;  %v1458_v42 = vld [vmem:[#allocation23 + $0xe0] sm:$0xff]  ;;  %v3166_v43 = vpack.c.bf16 %v1451_v37, %v1448_v36  ;;  %v5109_v44 = vadd.s32 %v1644_v39, %v5104_v33  ;;  %v3194_v45 = vpack.c.bf16 %v1453_v40, %v1450_v38  ;;  %v1457_v48 = vld [vmem:[#allocation23 + $0xd8] sm:$0xff]  ;;  %v1456_v49 = vld [vmem:[#allocation23 + $0xd0] sm:$0xff] }
 0x27e   : > { %s3085_s16 = sshll.u32 %s5091_s4, 2  ;;  %3161 = vmatprep.subr.bf16.mxu0 %v3160_v25  ;;  %3190 = vmatprep.subr.bf16.mxu1 %v4136_v0  ;;  %v3168_v46 = vpack.c.bf16 %v1458_v42, %v1455_v41  ;;  %v1454_v47 = vld [vmem:[#allocation23 + $0xc0] sm:$0xff]  ;;  %v1459_v50 = vld [vmem:[#allocation23 + $0xe8] sm:$0xff]  ;;  %v1461_v51 = vld [vmem:[#allocation23 + $0xf8] sm:$0xff]  ;;  %s5618_s4 = sld [smem:[#allocation78_spill]] }
 0x27f   : > { %s5673_s25 = smov (!%p1357_p2, %s1358_s25), 3  ;;  %v1464_v52 = vld [vmem:[#allocation23 + $0x110] sm:$0xff]  ;;  %v3170_v53 = vpack.c.bf16 %v1457_v48, %v1454_v47  ;;  %v1463_v55 = vld [vmem:[#allocation23 + $0x108] sm:$0xff]  ;;  %v1462_v56 = vld [vmem:[#allocation23 + $0x100] sm:$0xff]  ;;  %vm1652_vm0 = vcmp.lt.s32.totalorder %v5109_v44, 512  ;;  %v3197_v57 = vpack.c.bf16 %v1459_v50, %v1456_v49  ;;  %s4138_s9 = smov 4  }
 0x280   : > { %s5102_s29 = sadd.s32 %s3085_s16, %s5673_s25  ;;  %v1460_v54 = vld [vmem:[#allocation23 + $0xf0] sm:$0xff]  ;;  %v3172_v58 = vpack.c.bf16 %v1464_v52, %v1461_v51  ;;  %v1654_v59 = vld [vmem:[%s1123_s28] sm:$0xff]  ;;  %v1467_v63 = vld [vmem:[#allocation23 + $0x128] sm:$0xff]  ;;  %s5620_s28 = scalar_lea.vmem [#allocation11], %s5003_s2 }
 0x281   : > { %s3086_s20 = sshll.u32 %s5102_s29, 2  ;;  %3163 = vmatpush1.bf16.msra.mxu0 %v3162_v32  ;;  %3192 = vmatpush1.bf16.msra.mxu1 %v3191_v34  ;;  %v1636_v60 = vld [vmem:[%s1114_s3] sm:$0xf]  ;;  %v1465_v62 = vld [vmem:[#allocation23 + $0x118] sm:$0xff]  ;;  %v1470_v1 = vld [vmem:[#allocation23 + $0x140] sm:$0xff]  ;;  %v1656_v2 = vcombine.high %v1654_v59, %v1654_v59  ;;  %v3174_v4 = vpack.c.bf16 %v1463_v55, %v1460_v54  ;;  %s5619_s3 = scalar_lea.vmem [#allocation13], %s5012_s22 }
 0x282   : > { %3165 = vmatprep.subr.bf16.mxu0 %v3164_v35  ;;  %3193 = vmatprep.subr.bf16.mxu1 %v4136_v0  ;;  %v3200_v5 = vpack.c.bf16 %v1465_v62, %v1462_v56  ;;  %v3176_v6 = vpack.c.bf16 %v1470_v1, %v1467_v63  ;;  %v1466_v7 = vld [vmem:[#allocation23 + $0x120] sm:$0xff]  ;;  %v1469_v8 = vld [vmem:[#allocation23 + $0x138] sm:$0xff]  ;;  %v1468_v9 = vld [vmem:[#allocation23 + $0x130] sm:$0xff]  ;;  %s4140_s30 = smov 126   ;;  %s4141_s25 = smov 124  }
 0x283   : > { %1657 = vrot.lane.b32.xlu0 %v1654_v59, %s4138_s9  ;;  %1648 = vrot.lane.b32.xlu1 %v1636_v60, %s4138_s9  ;;  %v1471_v10 = vld [vmem:[#allocation23 + $0x148] sm:$0xff]  ;;  %v1473_v11 = vld [vmem:[#allocation23 + $0x158] sm:$0xff]  ;;  %v1476_v12 = vld [vmem:[#allocation23 + $0x170] sm:$0xff]  ;;  %v3178_v14 = vpack.c.bf16 %v1469_v8, %v1466_v7  ;;  %s3080_s29 = sshll.u32 %s4984_s24, 4  ;;  %s2535_s19 = scalar_lea.sflag [#allocation4], %s4984_s24 }
 0x284   : > { %s1366_s16 = scalar_lea.vmem %s5618_s4, %s3086_s20  ;;  %v1682_v13 = vld [vmem:[%s5619_s3] sm:$0xff]  ;;  %v1674_v15 = vld [vmem:[%s5620_s28] sm:$0xf]  ;;  %v1675_v16 = vld [vmem:[%s1150_s21] sm:$0xf]  ;;  %v3203_v17 = vpack.c.bf16 %v1471_v10, %v1468_v9  ;;  %v3180_v18 = vpack.c.bf16 %v1476_v12, %v1473_v11  ;;  %s3099_s21 = sadd.s32 4294967292, %s5094_s1 }
 0x285   : > { %3167 = vmatpush1.bf16.msra.mxu0 %v3166_v43  ;;  %3195 = vmatpush1.bf16.msra.mxu1 %v3194_v45  ;;  %v1637_v61 = vld [vmem:[%s1366_s16] sm:$0xf]  ;;  %v1472_v19 = vld [vmem:[#allocation23 + $0x150] sm:$0xff]  ;;  %v1475_v20 = vld [vmem:[#allocation23 + $0x168] sm:$0xff]  ;;  %v1684_v23 = vcombine.high %v1682_v13, %v1682_v13  ;;  %v1681_v24 = vsel %vm1652_vm0, %v1675_v16, 0.0  ;;  %v1641_v40 = vstv %s3099_s21  ;;  %v4142_v9 = vmov 0  }
 0x286   : > { %3169 = vmatprep.subr.bf16.mxu0 %v3168_v46  ;;  %3196 = vmatprep.subr.bf16.mxu1 %v4136_v0  ;;  %v1653_v3 = vsel %vm1652_vm0, %v1637_v61, 0.0  ;;  %v1474_v21 = vld [vmem:[#allocation23 + $0x160] sm:$0xff]  ;;  %v1477_v22 = vld [vmem:[#allocation23 + $0x178] sm:$0xff]  ;;  %v3182_v25 = vpack.c.bf16 %v1475_v20, %v1472_v19  ;;  %v1479_v27 = vld [vmem:[#allocation23 + $0x188] sm:$0xf]  ;;  %v1642_v41 = vadd.s32 %v1641_v40, %v5104_v33  ;;  %s4143_s4 = smov 120  }
 0x287   : > { %1666 = vrot.lane.b32.xlu0 %v1653_v3, %s4138_s9  ;;  %1659 = vrot.lane.b32.xlu1 %v1656_v2, %s4138_s9  ;;  %v3206_v26 = vpack.c.bf16 %v1477_v22, %v1474_v21  ;;  %v1478_v28 = vld [vmem:[#allocation23 + $0x180] sm:$0xf]  ;;  %v1480_v30 = vld [vmem:[#allocation23 + $0x190] sm:$0xf]  ;;  %v5168_v8 = vld [vmem:[#allocation25] sm:$0xf] }
 0x288   : > { %vm1646_vm4 = vcmp.ge.s32.totalorder %v1642_v41, 0  ;;  %3441 = vset.pattern.permute.xlu1 %v4142_v9  ;;  %3442 = vset.pattern.permute.xlu0 %v4142_v9  ;;  %s5621_s16 = scalar_lea.vmem [#allocation16], %s5003_s2  ;;  %s5623_s21 = sld [smem:[#allocation90_spill]]  ;;  %v2237_v16 = vld [vmem:[%s1195_s26] sm:$0xff] }
 0x289   : > { %3171 = vmatpush1.bf16.msra.mxu0 %v3170_v53  ;;  %3198 = vmatpush1.bf16.msra.mxu1 %v3197_v57  ;;  %v2197_v10 = vld [vmem:[%s5621_s16] sm:$0xf]  ;;  %s5624_s3 = sld [smem:[#allocation87_spill]]  ;;  %s3115_s2 = sadd.s32 4294967294, %s5094_s1 }
 0x28a   : > { %3173 = vmatprep.subr.bf16.mxu0 %v3172_v58  ;;  %3199 = vmatprep.subr.bf16.mxu1 %v4136_v0  ;;  %s5625_s26 = sld [smem:[#allocation91_spill]]  ;;  %s5626_s1 = sld [smem:[#allocation92_spill]] }
 0x28b   : > { %1685 = vrot.lane.b32.xlu0 %v1682_v13, %s4138_s9  ;;  %1677 = vrot.lane.b32.xlu1 %v1674_v15, %s4138_s9  ;;  %v2229_v15 = vld [vmem:[%s1186_s18] sm:$0xf]  ;;  %s1343_s28 = scalar_lea.vmem [#allocation26], %s3080_s29 }
 0x28d   : > { %3175 = vmatpush1.bf16.msra.mxu0 %v3174_v4  ;;  %3201 = vmatpush1.bf16.msra.mxu1 %v3200_v5 }
 0x28e   : > { %3177 = vmatprep.subr.bf16.mxu0 %v3176_v6  ;;  %3202 = vmatprep.subr.bf16.mxu1 %v4136_v0  ;;  %v1712_v12 = vld [vmem:[%s5623_s21] sm:$0xf]  ;;  %s2551_s21 = sshll.u32 %s1343_s28, 4  ;;  %s5287_s21 = int_to_ptr.vmem [resolvable:$true] %s2551_s21 }
 0x28f   : > { %1694 = vrot.lane.b32.xlu0 %v1681_v24, %s4138_s9  ;;  %1687 = vrot.lane.b32.xlu1 %v1684_v23, %s4138_s9  ;;  %s5622_s9 = scalar_lea.vmem [#allocation17], %s5012_s22  ;;  %s1405_s0 = scalar_lea.vmem %s5624_s3, %s3086_s20 }
 0x290   : > { %v2209_v11 = vld [vmem:[%s5622_s9] sm:$0xff]  ;;  %s3127_s20 = sshll.u32 %s5617_s27, 2  ;;  %s5628_s3 = sld [smem:[#allocation93_spill]] }
 0x291   : > { %3179 = vmatpush1.bf16.msra.mxu0 %v3178_v14  ;;  %3204 = vmatpush1.bf16.msra.mxu1 %v3203_v17  ;;  %v2211_v13 = vcombine.high %v2209_v11, %v2209_v11  ;;  %v2198_v14 = vld [vmem:[%s1177_s15] sm:$0xf]  ;;  %v2230_v19 = vld [vmem:[%s1405_s0] sm:$0xf]  ;;  %s3867_s27 = scalar_lea.vmem %s5287_s21, 256 }
 0x292   : > { %3181 = vmatprep.subr.bf16.mxu0 %v3180_v18  ;;  %3205 = vmatprep.subr.bf16.mxu1 %v4136_v0  ;;  %v2208_v17 = vsel %vm1652_vm0, %v2198_v14, 0.0  ;;  %v2239_v18 = vcombine.high %v2237_v16, %v2237_v16  ;;  %v2236_v20 = vsel %vm1652_vm0, %v2230_v19, 0.0  ;;  %v2267_v19 = vld [vmem:[%s5626_s1] sm:$0xff]  ;;  %p3868_p8 = scmp.ne.s32.totalorder %s5287_s21, %s3867_s27 }
 0x295   : > { %3183 = vmatpush1.bf16.msra.mxu0 %v3182_v25  ;;  %3207 = vmatpush1.bf16.msra.mxu1 %v3206_v26 }
 0x296   : > { %3094 = vmatprep.subr.msk.mxu0 %vm1485_vm1, %v1479_v27  ;;  %1598 = vmatprep.subr.mxu1 %v4139_v29  ;;  %s5629_s15 = smov %s5628_s3 }
 0x299   : > { %3095 = vmatpush1.msk.msra.mxu0 %vm1485_vm1, %v1478_v28  ;;  %3097 = vmatpush1.msk.msra.mxu1 %vm1485_vm1, %v1480_v30 }
 0x2e8   : > { %v1421_v0 = vpop.permute.xlu0 %1420  ;;  %v1417_v31 = vpop.permute.xlu1 %1416 }
 0x2e9   : > { %v1428_v35 = vsel %vm1427_vm2, %v1417_v31, %v1421_v0 }
 0x2ec   : > { %v1425_v32 = vpop.permute.xlu0 %1424 }
 0x2ed   : > { %v1429_v34 = vsel %vm1427_vm2, %v1421_v0, %v1425_v32 }
 0x2ee   : > { %3096 = vmatprep.mubr.msk.f32.mxu0 %vm1481_vm3, %v1429_v34  ;;  %3098 = vmatprep.mubr.msk.f32.mxu1 %vm1481_vm3, %v1429_v34 }
 0x2ef   : > { %1560 = vmatmul.mubr.f32.vlgmr.msra.gmra.mrb[0].mxu0 %v1428_v35  ;;  %1631 = vmatmul.mubr.f32.vlgmr.msra.gmra.mrb[0].mxu1 %v1428_v35 }
 0x2f0   : > { %1800 = vmatprep.mubr.f32.mxu1 %v4139_v29  ;;  %1949 = vmatprep.mubr.f32.mxu0 %v4139_v29 }
 0x2f5   : > { %v1658_v36 = vpop.permute.xlu0 %1657  ;;  %v1649_v37 = vpop.permute.xlu1 %1648 }
 0x2f6   : > { %v1651_v45 = vsel %vm1646_vm4, %v1649_v37, 0.0  ;;  %v2200_v37 = vstv %s3115_s2 }
 0x2f7   : > { %v1669_v50 = vsel %vm1481_vm3, %v1651_v45, %v1658_v36  ;;  %v2201_v41 = vadd.s32 %v2200_v37, %v5104_v33 }
 0x2f9   : > { %v1667_v38 = vpop.permute.xlu0 %1666  ;;  %v1660_v39 = vpop.permute.xlu1 %1659  ;;  %vm2202_vm11 = vcmp.ge.s32.totalorder %v2201_v41, 0 }
 0x2fa   : > { %v1670_v52 = vsel %vm1481_vm3, %v1660_v39, %v1667_v38  ;;  %v1661_v57 = vsel %vm1481_vm3, %v1658_v36, %v1660_v39 }
 0x2fd   : > { %v1686_v42 = vpop.permute.xlu0 %1685  ;;  %v1678_v43 = vpop.permute.xlu1 %1677 }
 0x2fe   : > { %v1680_v48 = vsel %vm1646_vm4, %v1678_v43, 0.0 }
 0x2ff   : > { %v1697_v59 = vsel %vm1481_vm3, %v1680_v48, %v1686_v42 }
 0x301   : > { %v1695_v46 = vpop.permute.xlu0 %1694  ;;  %v1688_v47 = vpop.permute.xlu1 %1687 }
 0x302   : > { %v1698_v53 = vsel %vm1481_vm3, %v1688_v47, %v1695_v46  ;;  %v1689_v62 = vsel %vm1481_vm3, %v1686_v42, %v1688_v47 }
 0x3c2   : > { %v1561_v49 = vpop.f32.mrb[0].mxu0  ;;  %v1632_v51 = vpop.f32.mrb[0].mxu1 }
 0x3c3   : > { %v1671_v54 = vmul.f32 %v1669_v50, %v1561_v49  ;;  %v1673_v55 = vmul.f32 %v1670_v52, %v1632_v51  ;;  %v1563_v56 = vpop.f32.mrb[1].mxu0  ;;  %v1634_v58 = vpop.f32.mrb[1].mxu1 }
 0x3c4   : > { %v1672_v60 = vmul.f32 %v1661_v57, %v1563_v56 }
 0x3c5   : > { %v1699_v61 = vadd.f32 %v1697_v59, %v1671_v54  ;;  %v1701_v63 = vadd.f32 %v1698_v53, %v1673_v55 }
 0x3c6   : > { %v1700_v1 = vadd.f32 %v1689_v62, %v1672_v60 }
 0x3c7   : > { %v1705_v2 = vmul.f32 0.2, %v1699_v61  ;;  %vm1704_vm5 = vcmp.ge.f32.partialorder %v1701_v63, 0.0  ;;  %v1707_v3 = vmul.f32 0.2, %v1701_v63  ;;  %vm1702_vm6 = vcmp.ge.f32.partialorder %v1699_v61, 0.0 }
 0x3c8   : > { %vm1703_vm7 = vcmp.ge.f32.partialorder %v1700_v1, 0.0  ;;  %v1706_v4 = vmul.f32 0.2, %v1700_v1 }
 0x3c9   : > { %v5162_v5 = vsel %vm1704_vm5, %v1701_v63, %v1707_v3  ;;  %v1708_v7 = vsel %vm1702_vm6, %v1699_v61, %v1705_v2 }
 0x3ca   : > { %1723 = vrot.lane.b32.xlu0 %v5162_v5, %s4140_s30  ;;  %v1709_v6 = vsel %vm1703_vm7, %v1700_v1, %v1706_v4 }
 0x3cb   : > { %1721 = vrot.lane.b32.xlu1 %v1709_v6, %s4140_s30  ;;  %3105 = vmatprep.subr.msk.mxu0 %vm1485_vm1, %v1709_v6 }
 0x3cc   : > { %3106 = vmatpush1.msk.msra.mxu0 %vm1485_vm1, %v1708_v7 }
 0x3cd   : > { %3107 = vmatmul.mubr.msk.f32.vlgmr.msra.gmra.mrb[2].mxu0 %vm1481_vm3, %v5168_v8 }
 0x3ce   : > { %1714 = vrot.lane.b32.xlu0 %v5168_v8, %s4141_s25  ;;  %2109 = vmatprep.mubr.f32.mxu0 %v4139_v29 }
 0x3cf   : > { %1719 = vrot.lane.b32.xlu1 %v1708_v7, %s4140_s30 }
 0x3d2   : > { %2032 = vrot.lane.b32.xlu0 %v5162_v5, %s4141_s25 }
 0x3d3   : > { %2030 = vrot.lane.b32.xlu1 %v1709_v6, %s4141_s25 }
 0x3d6   : > { %2026 = vrot.lane.b32.xlu0 %v5168_v8, %s4143_s4 }
 0x3d7   : > { %2028 = vrot.lane.b32.xlu1 %v1708_v7, %s4141_s25 }
 0x3da   : > { %2204 = vrot.lane.b32.xlu0 %v2197_v10, %s4137_s11 }
 0x3db   : > { %2191 = vperm.xlu1 %3441, %v1712_v12  }
 0x3de   : > { %2214 = vrot.lane.b32.xlu0 %v2211_v13, %s4137_s11 }
 0x3df   : > { %2212 = vrot.lane.b32.xlu1 %v2209_v11, %s4137_s11 }
 0x3e2   : > { %2232 = vrot.lane.b32.xlu0 %v2229_v15, %s4137_s11 }
 0x3e3   : > { %2221 = vrot.lane.b32.xlu1 %v2208_v17, %s4137_s11 }
 0x3e6   : > { %2242 = vrot.lane.b32.xlu0 %v2239_v18, %s4137_s11  ;;  %v2266_v18 = vld [vmem:[%s5625_s26] sm:$0xff] }
 0x3e7   : > { %2240 = vrot.lane.b32.xlu1 %v2237_v16, %s4137_s11 }
 0x3eb   : > { %2249 = vrot.lane.b32.xlu1 %v2236_v20, %s4137_s11 }
 0x43c   : > { %v1724_v21 = vpop.permute.xlu0 %1723 }
 0x43d   : > { %v1722_v22 = vpop.permute.xlu1 %1721 }
 0x43e   : > { %v1727_v23 = vsel %vm1725_vm8, %v1722_v22, %v1724_v21 }
 0x43f   : > { %3100 = vmatprep.subr.msk.mxu1 %vm1485_vm1, %v1727_v23 }
 0x440   : > { %v1715_v24 = vpop.permute.xlu0 %1714 }
 0x441   : > { %v1720_v25 = vpop.permute.xlu1 %1719 }
 0x442   : > { %v1726_v26 = vsel %vm1725_vm8, %v1720_v25, %v1722_v22 }
 0x443   : > { %3101 = vmatpush1.msk.msra.mxu1 %vm1485_vm1, %v1726_v26 }
 0x444   : > { %v2033_v27 = vpop.permute.xlu0 %2032  ;;  %3102 = vmatmul.mubr.msk.f32.vlgmr.msra.gmra.mrb[2].mxu1 %vm1481_vm3, %v1715_v24  ;;  %3137 = vmatprep.subr.mxu1 %v4139_v29 }
 0x445   : > { %3138 = vmatpush3.msk.msra.mxu1 %vm1485_vm1, %v1724_v21  ;;  %v2031_v44 = vpop.permute.xlu1 %2030  ;;  %3139 = vmatprep.mubr.msk.f32.mxu1 %vm4144_vm10, %v4139_v29 }
 0x446   : > { %v2036_v28 = vsel %vm2034_vm9, %v2031_v44, %v2033_v27  ;;  %3142 = vmatprep.subr.mxu1 %v4139_v29 }
 0x447   : > { %3110 = vmatprep.subr.msk.mxu0 %vm1485_vm1, %v2036_v28 }
 0x448   : > { %3140 = vmatmul.mubr.msk.f32.vlgmr.msra.gmra.mrb[4].mxu1 %vm1481_vm3, %v1715_v24  ;;  %v2027_v0 = vpop.permute.xlu0 %2026 }
 0x449   : > { %3143 = vmatpush3.msk.msra.mxu1 %vm1485_vm1, %v5162_v5  ;;  %v2029_v30 = vpop.permute.xlu1 %2028  ;;  %3144 = vmatprep.mubr.msk.f32.mxu1 %vm4144_vm10, %v4139_v29 }
 0x44a   : > { %v2035_v31 = vsel %vm2034_vm9, %v2029_v30, %v2031_v44  ;;  %3147 = vmatprep.subr.mxu1 %v4139_v29 }
 0x44b   : > { %3111 = vmatpush1.msk.msra.mxu0 %vm1485_vm1, %v2035_v31 }
 0x44c   : > { %3145 = vmatmul.mubr.msk.f32.vlgmr.msra.gmra.mrb[6].mxu1 %vm1481_vm3, %v5168_v8  ;;  %3112 = vmatmul.mubr.msk.f32.vlgmr.msra.gmra.mrb[2].mxu0 %vm1481_vm3, %v2027_v0  ;;  %v2205_v34 = vpop.permute.xlu0 %2204 }
 0x44d   : > { %3148 = vmatpush3.msk.msra.mxu1 %vm1485_vm1, %v2033_v27  ;;  %3149 = vmatprep.mubr.msk.f32.mxu1 %vm4144_vm10, %v4139_v29  ;;  %v2207_v49 = vsel %vm2202_vm11, %v2205_v34, 0.0 }
 0x44e   : > { %2352 = vmatprep.mubr.f32.mxu0 %v4139_v29 }
 0x450   : > { %3150 = vmatmul.mubr.msk.f32.vlgmr.msra.gmra.mrb[8].mxu1 %vm1481_vm3, %v2027_v0  ;;  %v2215_v36 = vpop.permute.xlu0 %2214 }
 0x454   : > { %v2233_v43 = vpop.permute.xlu0 %2232 }
 0x455   : > { %v2235_v55 = vsel %vm2202_vm11, %v2233_v43, 0.0 }
 0x458   : > { %v2243_v56 = vpop.permute.xlu0 %2242 }
 0x45a   : > { %v2192_v32 = vpop.permute.xlu1 %2191 }
 0x45e   : > { %v2213_v35 = vpop.permute.xlu1 %2212 }
 0x45f   : > { %v2224_v58 = vsel %vm1427_vm2, %v2207_v49, %v2213_v35  ;;  %v2216_v33 = vsel %vm1427_vm2, %v2213_v35, %v2215_v36 }
 0x462   : > { %v2222_v40 = vpop.permute.xlu1 %2221 }
 0x463   : > { %v2225_v6 = vsel %vm1427_vm2, %v2215_v36, %v2222_v40 }
 0x466   : > { %v2241_v46 = vpop.permute.xlu1 %2240 }
 0x467   : > { %v2252_v1 = vsel %vm1427_vm2, %v2235_v55, %v2241_v46  ;;  %v2244_v2 = vsel %vm1427_vm2, %v2241_v46, %v2243_v56 }
 0x46a   : > { %v2250_v5 = vpop.permute.xlu1 %2249 }
 0x46b   : > { %v2253_v10 = vsel %vm1427_vm2, %v2243_v56, %v2250_v5 }
 0x517   : > { %v1802_v38 = vpop.f32.mrb[2].mxu1 }
 0x518   : > { %v1804_v39 = vpop.f32.mrb[3].mxu1 }
 0x51b   : > { %v1873_v42 = vpop.f32.mrb[4].mxu1 }
 0x51c   : > { %v3141_v45 = vpop.f32.mrb[5].mxu1 }
 0x51f   : > { %v2022_v47 = vpop.f32.mrb[6].mxu1  ;;  %v2111_v48 = vpop.f32.mrb[2].mxu0 }
 0x520   : > { %v2023_v50 = vadd.f32 %v2022_v47, %v1873_v42  ;;  %v3208_v51 = vadd.f32 %v2111_v48, %v1802_v38  ;;  %v2113_v52 = vpop.f32.mrb[3].mxu0  ;;  %v3146_v53 = vpop.f32.mrb[7].mxu1 }
 0x521   : > { %v3209_v54 = vadd.f32 %v2113_v52, %v1804_v39 }
 0x522   : > { %v2194_v57 = vadd.f32 %v3208_v51, %v2192_v32 }
 0x523   : > { %v2195_v59 = vadd.f32 %v3209_v54, %v2192_v32  ;;  %v2182_v60 = vpop.f32.mrb[8].mxu1 }
 0x524   : > { %v2226_v61 = vmul.f32 %v2224_v58, %v2194_v57  ;;  %v2188_v62 = vadd.f32 %v2182_v60, %v2023_v50  ;;  %v3151_v63 = vpop.f32.mrb[9].mxu1 }
 0x525   : > { %v2227_v3 = vmul.f32 %v2216_v33, %v2195_v59 }
 0x526   : > { %v2196_v4 = vadd.f32 %v2192_v32, %v2188_v62  ;;  %v2254_v7 = vadd.f32 %v2252_v1, %v2226_v61 }
 0x527   : > { %v2255_v8 = vadd.f32 %v2244_v2, %v2227_v3 }
 0x528   : > { %v2228_v9 = vmul.f32 %v2225_v6, %v2196_v4  ;;  %v2260_v14 = vmul.f32 0.2, %v2254_v7  ;;  %vm2257_vm14 = vcmp.ge.f32.partialorder %v2254_v7, 0.0 }
 0x529   : > { %vm2258_vm12 = vcmp.ge.f32.partialorder %v2255_v8, 0.0  ;;  %v2261_v11 = vmul.f32 0.2, %v2255_v8 }
 0x52a   : > { %v2256_v12 = vadd.f32 %v2253_v10, %v2228_v9  ;;  %v2263_v17 = vsel %vm2257_vm14, %v2254_v7, %v2260_v14 }
 0x52b   : > { %v2264_v13 = vsel %vm2258_vm12, %v2255_v8, %v2261_v11 }
 0x52c   : > { %2276 = vrot.lane.b32.xlu0 %v2264_v13, %s4140_s30  ;;  %vm2259_vm13 = vcmp.ge.f32.partialorder %v2256_v12, 0.0  ;;  %v2262_v15 = vmul.f32 0.2, %v2256_v12 }
 0x52e   : > { %v2265_v16 = vsel %vm2259_vm13, %v2256_v12, %v2262_v15 }
 0x52f   : > { %2278 = vrot.lane.b32.xlu1 %v2265_v16, %s4140_s30 }
 0x530   : > { %2274 = vrot.lane.b32.xlu0 %v2263_v17, %s4140_s30  ;;  %s2547_s30 = sadd.s32 %s3127_s20, %s3081_s12  ;;  %s4145_s12 = smov [#allocation26]  }
 0x531   : > { %s3871_s2 = sshll.u32 %s4145_s12, 4  ;;  %s3872_s2 = int_to_ptr.vmem [resolvable:$false] %s3871_s2 }
 0x532   : > { %s3873_s22 = scalar_lea.vmem %s3872_s2, 512  ;;  %p3874_p1 = scmp.lt.s32.totalorder %s5287_s21, %s3872_s2 }
 0x533   : > { %2269 = vrot.lane.b32.xlu1 %v2266_v18, %s4141_s25  ;;  %p3875_p6 = scmp.lt.s32.totalorder %s3873_s22, %s3867_s27 }
 0x534   : > { %2440 = vrot.lane.b32.xlu0 %v2264_v13, %s4141_s25 }
 0x535   : > { %p3876_p10 = por %p3875_p6, %p3874_p1 }
 0x537   : > { %2442 = vrot.lane.b32.xlu1 %v2265_v16, %s4141_s25 }
 0x538   : > { %2438 = vrot.lane.b32.xlu0 %v2263_v17, %s4141_s25  ;;  %s5627_s25 = sld [smem:[#allocation70_spill]] }
 0x53b   : > { %2436 = vrot.lane.b32.xlu1 %v2266_v18, %s4143_s4  ;;  %s3128_s4 = sshll.u32 %s2547_s30, 7 }
 0x53c   : > { %2527 = vperm.xlu0 %3442, %v2267_v19   ;;  %s5285_s0 = scalar_lea.hbm %s5628_s3, %s3128_s4 }
 0x53e   : > { %p5630_p3 = scmp.ne.s32.totalorder %s5627_s25, 0 }
 0x540   : > { %p3869_p13 = pnand %p3868_p8, %p5630_p3 }
 0x542   : > { %p3870_p0 = pneg %p3869_p13 }
 0x544   : > { %p3877_p12 = pnand %p3876_p10, %p3870_p0 }
 0x59e   : > { %v2277_v20 = vpop.permute.xlu0 %2276 }
 0x5a1   : > { %v2279_v21 = vpop.permute.xlu1 %2278 }
 0x5a2   : > { %v2281_v22 = vsel %vm1725_vm8, %v2277_v20, %v2279_v21  ;;  %v2275_v23 = vpop.permute.xlu0 %2274 }
 0x5a3   : > { %v2280_v24 = vsel %vm1725_vm8, %v2275_v23, %v2277_v20  ;;  %3116 = vmatprep.subr.msk.mxu0 %vm1485_vm1, %v2281_v22 }
 0x5a4   : > { %3117 = vmatpush1.msk.msra.mxu0 %vm1485_vm1, %v2280_v24 }
 0x5a5   : > { %v2270_v25 = vpop.permute.xlu1 %2269  ;;  %3119 = vmatprep.subr.msk.mxu0 %vm1485_vm1, %v2264_v13 }
 0x5a6   : > { %3118 = vmatmul.mubr.msk.f32.vlgmr.msra.gmra.mrb[4].mxu0 %vm1481_vm3, %v2270_v25  ;;  %v2441_v26 = vpop.permute.xlu0 %2440 }
 0x5a7   : > { %3120 = vmatpush1.msk.msra.mxu0 %vm1485_vm1, %v2263_v17  ;;  %2429 = vmatprep.mubr.f32.mxu0 %v4139_v29 }
 0x5a9   : > { %v2443_v27 = vpop.permute.xlu1 %2442 }
 0x5aa   : > { %v2445_v44 = vsel %vm2034_vm9, %v2441_v26, %v2443_v27  ;;  %v2439_v28 = vpop.permute.xlu0 %2438 }
 0x5ab   : > { %3122 = vmatprep.subr.msk.mxu0 %vm1485_vm1, %v2445_v44  ;;  %v2444_v30 = vsel %vm2034_vm9, %v2439_v28, %v2441_v26 }
 0x5ad   : > { %v2437_v0 = vpop.permute.xlu1 %2436 }
 0x5ae   : > { %3121 = vmatmul.mubr.msk.f32.vlgmr.msra.gmra.mrb[4].mxu0 %vm1481_vm3, %v2266_v18 }
 0x5af   : > { %3123 = vmatpush1.msk.msra.mxu0 %vm1485_vm1, %v2444_v30  ;;  %2516 = vmatprep.mubr.f32.mxu0 %v4139_v29 }
 0x5b6   : > { %3124 = vmatmul.mubr.msk.f32.vlgmr.msra.gmra.mrb[4].mxu0 %vm1481_vm3, %v2437_v0 }
 0x5bb   : > { %v2528_v31 = vpop.permute.xlu0 %2527 }
 0x689   : > { %v2518_v32 = vpop.f32.mrb[4].mxu0 }
 0x68a   : > { %v2530_v34 = vadd.f32 %v2528_v31, %v2518_v32  ;;  %v2520_v35 = vpop.f32.mrb[5].mxu0 }
 0x68b   : > { %v2531_v36 = vadd.f32 %v2528_v31, %v2520_v35 }
 0x68c   : > { %2532 = vst [vmem:[%s1343_s28] sm:$0xff] %v2530_v34 }
 0x68d   : > { %2533 = vst [vmem:[%s1343_s28 + $0x8] sm:$0xff] %v2531_v36 }
 0x68e   : > { %3880 = shalt.err (!%p3877_p12)
}
 0x68f   : > { %s3881_s24 = scalar_lea.hbm %s5285_s0, 256  ;;  %s3885_s11 = scalar_lea.hbm %s5629_s15, 1024 }
 0x690   : > { %p3882_p9 = scmp.ne.s32.totalorder %s5285_s0, %s3881_s24  ;;  %p3886_p5 = scmp.lt.u32.totalorder %s5285_s0, %s5629_s15 }
 0x691   : > { %p3887_p2 = scmp.lt.u32.totalorder %s3885_s11, %s3881_s24  ;;  %p3889_p8 = scmp.lt.u32.totalorder %s3881_s24, %s5285_s0 }
 0x692   : > { %p3883_p7 = pnand %p3882_p9, %p5630_p3 }
 0x693   : > { %p3888_p11 = por %p3887_p2, %p3886_p5 }
 0x694   : > { %p3884_p4 = pneg %p3883_p7 }
 0x695   : > { %p3890_p13 = por %p3889_p8, %p3888_p11 }
 0x697   : > { %p3891_p0 = pnand %p3890_p13, %p3884_p4 }
 0x699   : > { %3894 = shalt.err (!%p3891_p0)
}
 0x69a   : > { %3250 = dma.vmem_to_hbm [thread:$0]  (%p5630_p3), %s5287_s21, 256, %s5285_s0, %s2535_s19  }
 0x69b PF: > { %s5631_s20 = sld [smem:[#allocation47_spill]]  ;;  %s5632_s30 = sld [smem:[#allocation71_spill]] }
 0x69c   : > { %p3267_p1 = scmp.ge.s32.totalorder %s4117_s17, 2 }
 0x6a1   : > { %s2563_s4 = sand.u32 1, %s5631_s20   ;;  %p5633_p6 = scmp.ne.s32.totalorder %s5632_s30, 0 }
 0x6a2   : > { %s2564_s28 = scalar_lea.sflag [#allocation4], %s2563_s4 }
 0x6a3   : > { %p3260_p10 = pnand %p3267_p1, %p5633_p6 }
 0x6a5   : > { %4032 = dma.done.wait (!%p3260_p10), %s2564_s28, 256  }
 0x6a6   : > { %4034 = vsyncadd (!%p3260_p10), %s2564_s28, 4294967040  ;;  %s55_s17 = sadd.s32 1, %s4117_s17   ;;  %s5635_s1 = sld [smem:[#allocation42_spill]] }
 0x6a7   : > { %p5316_p12 = scmp.ge.s32.totalorder %s55_s17, 6   ;;  %s5636_s25 = sld [smem:[#allocation69_spill]] }
 0x6a8   : > { %s5637_s24 = sld [smem:[#allocation43_spill]]  ;;  %s5638_s2 = sld [smem:[#allocation44_spill]] }
 0x6a9   : > { %s5639_s21 = sld [smem:[#allocation67_spill]]  ;;  %s5640_s3 = sld [smem:[#allocation45_spill]] }
 0x6aa   : > { %s5641_s26 = sld [smem:[#allocation46_spill]]  ;;  %s5642_s27 = sld [smem:[#allocation65_spill]] }
 0x6ab   : > { %s5643_s28 = sld [smem:[#allocation48_spill]]  ;;  %s5644_s4 = sld [smem:[#allocation49_spill]] }
 0x6ac   : > { %s5645_s29 = sld [smem:[#allocation61_spill]]  ;;  %s5646_s30 = sld [smem:[#allocation50_spill]] }
 0x6ad   : > { %s5647_s0 = sld [smem:[#allocation51_spill]]  ;;  %s5648_s9 = sld [smem:[#allocation59_spill]] }
 0x6ae   : > { %s5649_s20 = sld [smem:[#allocation54_spill]]  ;;  %s5650_s22 = smov %s4049_s23 }
 0x6af   : > { %s5651_s18 = sld [smem:[#allocation56_spill]]  ;;  %s5652_s23 = smov %s5636_s25 }
 0x6b0   : > { %s5653_s12 = sld [smem:[#allocation57_spill]]  ;;  %s5654_s25 = smov %s5639_s21 }
 0x6b1   : > { %s5656_s19 = smov %s4113_s14  ;;  %54 = sbr.rel (!%p5316_p12) target bundleno = 48 (0x30), region = 303 }
 0x6b3   : > { %s5655_s21 = smov %s5648_s9 }
 0x6b6   : > { %s5657_s14 = smov %s5653_s12 }
 0x6b8   :  { %2569 = vsyncpa [#allocation3], 1 }
 0x6b9   :  { %2571 = vsyncpa [#allocation3 + $0x1], 1 }
 0x6ba   :  { %2572 = vsyncpa [#allocation6], 1 }
 0x6bb   :  { %2574 = vsyncpa [#allocation6 + $0x1], 1 }
 0x6bc   :  { %2575 = vsyncpa [#allocation9], 1 }
 0x6bd   :  { %2577 = vsyncpa [#allocation9 + $0x1], 1 }
 0x6be   :  { %2578 = vsyncpa [#allocation12], 1 }
 0x6bf   :  { %2580 = vsyncpa [#allocation12 + $0x1], 1 }
 0x6c0   :  { %2581 = vsyncpa [#allocation15], 1 }
 0x6c1   :  { %2583 = vsyncpa [#allocation15 + $0x1], 1 }
 0x6c2   :  { %2584 = vsyncpa [#allocation18], 1 }
 0x6c3   :  { %2586 = vsyncpa [#allocation18 + $0x1], 1 }
 0x6c4   :  { %2587 = vsyncpa [#allocation21], 1 }
 0x6c5   :  { %2589 = vsyncpa [#allocation21 + $0x1], 1 }
 0x6c6   :  { %2590 = vsyncpa [#allocation24], 1 }
 0x6c7   :  { %2591 = vsyncpa [#allocation4], 1 }
 0x6c8   :  { %2593 = vsyncpa [#allocation4 + $0x1], 1 }

</bundles_post_ra>
